<compile_context>
chip_gen: v5e
topology: v5e:2x2
jax: 0.10.0
libtpu: 0.0.40
codegen_flags: <defaults>
</compile_context>

<pallas_src>
import functools

import jax
import jax.numpy as jnp
from jax import lax
from jax.experimental import pallas as pl
from jax.experimental.pallas import tpu as pltpu


def satt2_kernel(x_ref, w_ref, o_ref, *, c_in, c4):
    # x_ref: (t_tile, C, N) bf16 with x[t, c, n] = seq[b, c, n, t]
    # w_ref: (2C, C) bf16; rows [0, C) = conv1, [C, 2C) = conv2, m-major rows
    # o_ref: (t_tile, N, N) f32
    x = x_ref[...]                                        # (t, C, N) bf16
    t_blk, _, n = x.shape
    w = jnp.broadcast_to(w_ref[...], (t_blk, 2 * c_in, c_in))   # (t, 2C, C)

    # Single batched channel projection covering both convs: y[t, r, n].
    y = lax.dot_general(w, x, (((2,), (1,)), ((0,), (0,))),
                        preferred_element_type=jnp.float32)     # (t, 2C, N) f32

    acc = jnp.zeros((t_blk, n, n), jnp.float32)
    for m in range(4):                      # static unroll over group-of-4 axis
        a = y[:, m * c4:(m + 1) * c4, :].astype(jnp.bfloat16)             # conv1
        b = y[:, c_in + m * c4:c_in + (m + 1) * c4, :].astype(jnp.bfloat16)  # conv2
        # logits[t, n, q] = sum_c a[t, c, n] * b[t, c, q]
        logits = lax.dot_general(a, b, (((1,), (1,)), ((0,), (0,))),
                                 preferred_element_type=jnp.float32)      # (t,N,N)
        acc = acc + jax.nn.sigmoid(logits)
    o_ref[...] = (acc * 0.25).astype(o_ref.dtype)


def satt2_forward(seq, w1, w2, *, t_tile=None):
    """seq: (B, C, N, T) f32.  w1, w2: (C, C) 1x1-conv weights (bias=False).

    Returns (B, T, N, N) f32, matching SATT_2.forward.
    """
    B, C, N, T = seq.shape
    assert C % 4 == 0, "c_in must be divisible by 4"
    c4 = C // 4
    if t_tile is None:
        t_tile = T          # whole T per step at these sizes
    assert T % t_tile == 0

    # Permute conv output channels to m-major order so the kernel can take
    # static contiguous slices (w_perm[m*c4 + c, :] = w[4*c + m, :]) and stack
    # both convs into one weight operand.
    perm = jnp.arange(C).reshape(c4, 4).T.reshape(-1)
    w_stack = jnp.concatenate([w1[perm], w2[perm]], axis=0).astype(jnp.bfloat16)

    # (B, T, C, N) staged in bf16 (halves input HBM bytes); allow_input_fusion
    # lets XLA fold this transpose+cast into the kernel input.
    x = jnp.transpose(seq, (0, 3, 1, 2)).astype(jnp.bfloat16)

    kernel = functools.partial(satt2_kernel, c_in=C, c4=c4)
    out = pl.pallas_call(
        kernel,
        out_shape=jax.ShapeDtypeStruct((B, T, N, N), jnp.float32),
        grid_spec=pltpu.PrefetchScalarGridSpec(
            num_scalar_prefetch=0,
            grid=(B, T // t_tile),
            in_specs=[
                pl.BlockSpec((None, t_tile, C, N), lambda b, tb: (b, tb, 0, 0)),
                pl.BlockSpec((2 * C, C), lambda b, tb: (0, 0)),
            ],
            out_specs=pl.BlockSpec((None, t_tile, N, N),
                                   lambda b, tb: (b, tb, 0, 0)),
        ),
        compiler_params=pltpu.CompilerParams(
            dimension_semantics=("parallel", "parallel"),
            vmem_limit_bytes=32 * 1024 * 1024,
            allow_input_fusion=[True, False],
        ),
    )(x, w_stack)
    return out


def satt2_reference(seq, w1, w2):
    """Pure-JAX f32 transliteration of the PyTorch forward (verification)."""
    B, C, N, T = seq.shape
    c4 = C // 4
    y1 = jnp.einsum('oc,bcnt->bont', w1, seq)
    y2 = jnp.einsum('oc,bcnt->bont', w2, seq)
    f1 = y1.reshape(B, c4, 4, N, T).transpose(0, 3, 1, 4, 2)   # b n c l m
    f2 = y2.reshape(B, c4, 4, N, T).transpose(0, 1, 3, 4, 2)   # b c q l m
    logits = jnp.einsum('bnclm,bcqlm->bnqlm', f1, f2)
    logits = jnp.transpose(logits, (0, 3, 1, 2, 4))            # b l n q m
    return jnp.mean(jax.nn.sigmoid(logits), axis=-1)           # (B, T, N, N)


if __name__ == "__main__":
    # Small shapes consistent with the module: c_in divisible by 4, T = 12
    # (matching the LayerNorm([N, N, 12]) declared but unused in forward).
    B, C, N, T = 2, 8, 8, 12
    key = jax.random.PRNGKey(0)
    k1, k2, k3 = jax.random.split(key, 3)
    seq = jax.random.normal(k1, (B, C, N, T), jnp.float32)
    # 1x1 conv weights (c_in, c_in, 1, 1) stored as (c_in, c_in), bias=False.
    w1 = jax.random.normal(k2, (C, C), jnp.float32) * 0.1
    w2 = jax.random.normal(k3, (C, C), jnp.float32) * 0.1

    out = jax.jit(satt2_forward)(seq, w1, w2)
    jax.block_until_ready(out)

    ref = satt2_reference(seq, w1, w2)
    assert out.shape == (B, T, N, N)
    # bf16 matmul operands (f32 accumulation) -> relaxed tolerance vs f32 ref.
    assert jnp.allclose(out, ref, atol=2e-2, rtol=2e-2), "mismatch vs reference"
    print("KERNEL_OK")
</pallas_src>

<mosaic_0001>
module attributes {stable_mosaic.version = 11 : i64} {
  func.func @satt2_kernel(%arg0: i32, %arg1: i32, %arg2: memref<1x12x8x8xbf16, #tpu.memory_space<vmem>>, %arg3: memref<16x8xbf16, #tpu.memory_space<vmem>>, %arg4: memref<1x12x8x8xf32, #tpu.memory_space<vmem>>) attributes {dimension_semantics = [#tpu.dimension_semantics<parallel>, #tpu.dimension_semantics<parallel>], iteration_bounds = array<i64: 2, 1>, scalar_prefetch = 0 : i64, scratch_operands = 0 : i64, tpu.core_type = #tpu.core_type<tc>, window_params = [{transform_indices = @transform_0, window_bounds = array<i64: 1, 12, 8, 8>}, {pipeline_mode = #tpu.pipeline_mode<synchronous>, transform_indices = @transform_1, window_bounds = array<i64: 16, 8>}, {transform_indices = @transform_2, window_bounds = array<i64: 1, 12, 8, 8>}]} {
    %c0 = arith.constant 0 : index
    %c0_0 = arith.constant 0 : index
    %c0_1 = arith.constant 0 : index
    %c0_2 = arith.constant 0 : index
    %0 = vector.load %arg2[%c0, %c0_0, %c0_1, %c0_2] : memref<1x12x8x8xbf16, #tpu.memory_space<vmem>>, vector<1x12x8x8xbf16>
    %1 = vector.shape_cast %0 : vector<1x12x8x8xbf16> to vector<12x8x8xbf16>
    %c0_3 = arith.constant 0 : index
    %c0_4 = arith.constant 0 : index
    %2 = vector.load %arg3[%c0_3, %c0_4] : memref<16x8xbf16, #tpu.memory_space<vmem>>, vector<16x8xbf16>
    %3 = vector.shape_cast %2 : vector<16x8xbf16> to vector<1x16x8xbf16>
    %4 = vector.broadcast %3 : vector<1x16x8xbf16> to vector<12x16x8xbf16>
    %cst = arith.constant dense<0.000000e+00> : vector<12x16x8xf32>
    %5 = tpu.matmul %4, %1, %cst {dimension_numbers = #tpu.dot_dimension_numbers<[2], [1], [1], [2], [0, 0, 0, 1, 1, 2], [0], [0]>} : vector<12x16x8xbf16>, vector<12x8x8xbf16>, vector<12x16x8xf32> -> vector<12x16x8xf32>
    %cst_5 = arith.constant 0.000000e+00 : f32
    %6 = vector.broadcast %cst_5 : f32 to vector<12x8x8xf32>
    %7 = vector.extract_strided_slice %5 {offsets = [0, 0, 0], sizes = [12, 2, 8], strides = [1, 1, 1]} : vector<12x16x8xf32> to vector<12x2x8xf32>
    %8 = arith.truncf %7 : vector<12x2x8xf32> to vector<12x2x8xbf16>
    %9 = vector.extract_strided_slice %5 {offsets = [0, 8, 0], sizes = [12, 2, 8], strides = [1, 1, 1]} : vector<12x16x8xf32> to vector<12x2x8xf32>
    %10 = arith.truncf %9 : vector<12x2x8xf32> to vector<12x2x8xbf16>
    %cst_6 = arith.constant dense<0.000000e+00> : vector<12x8x8xf32>
    %11 = tpu.matmul %8, %10, %cst_6 {dimension_numbers = #tpu.dot_dimension_numbers<[1], [1], [2], [2], [0, 0, 0, 2, 1, 2], [0], [0]>} : vector<12x2x8xbf16>, vector<12x2x8xbf16>, vector<12x8x8xf32> -> vector<12x8x8xf32>
    %12 = arith.negf %11 : vector<12x8x8xf32>
    %13 = math.exp %12 : vector<12x8x8xf32>
    %cst_7 = arith.constant 1.000000e+00 : f32
    %14 = vector.broadcast %cst_7 : f32 to vector<12x8x8xf32>
    %15 = arith.addf %14, %13 : vector<12x8x8xf32>
    %16 = arith.divf %14, %15 : vector<12x8x8xf32>
    %17 = arith.addf %6, %16 : vector<12x8x8xf32>
    %18 = vector.extract_strided_slice %5 {offsets = [0, 2, 0], sizes = [12, 2, 8], strides = [1, 1, 1]} : vector<12x16x8xf32> to vector<12x2x8xf32>
    %19 = arith.truncf %18 : vector<12x2x8xf32> to vector<12x2x8xbf16>
    %20 = vector.extract_strided_slice %5 {offsets = [0, 10, 0], sizes = [12, 2, 8], strides = [1, 1, 1]} : vector<12x16x8xf32> to vector<12x2x8xf32>
    %21 = arith.truncf %20 : vector<12x2x8xf32> to vector<12x2x8xbf16>
    %cst_8 = arith.constant dense<0.000000e+00> : vector<12x8x8xf32>
    %22 = tpu.matmul %19, %21, %cst_8 {dimension_numbers = #tpu.dot_dimension_numbers<[1], [1], [2], [2], [0, 0, 0, 2, 1, 2], [0], [0]>} : vector<12x2x8xbf16>, vector<12x2x8xbf16>, vector<12x8x8xf32> -> vector<12x8x8xf32>
    %23 = arith.negf %22 : vector<12x8x8xf32>
    %24 = math.exp %23 : vector<12x8x8xf32>
    %cst_9 = arith.constant 1.000000e+00 : f32
    %25 = vector.broadcast %cst_9 : f32 to vector<12x8x8xf32>
    %26 = arith.addf %25, %24 : vector<12x8x8xf32>
    %27 = arith.divf %25, %26 : vector<12x8x8xf32>
    %28 = arith.addf %17, %27 : vector<12x8x8xf32>
    %29 = vector.extract_strided_slice %5 {offsets = [0, 4, 0], sizes = [12, 2, 8], strides = [1, 1, 1]} : vector<12x16x8xf32> to vector<12x2x8xf32>
    %30 = arith.truncf %29 : vector<12x2x8xf32> to vector<12x2x8xbf16>
    %31 = vector.extract_strided_slice %5 {offsets = [0, 12, 0], sizes = [12, 2, 8], strides = [1, 1, 1]} : vector<12x16x8xf32> to vector<12x2x8xf32>
    %32 = arith.truncf %31 : vector<12x2x8xf32> to vector<12x2x8xbf16>
    %cst_10 = arith.constant dense<0.000000e+00> : vector<12x8x8xf32>
    %33 = tpu.matmul %30, %32, %cst_10 {dimension_numbers = #tpu.dot_dimension_numbers<[1], [1], [2], [2], [0, 0, 0, 2, 1, 2], [0], [0]>} : vector<12x2x8xbf16>, vector<12x2x8xbf16>, vector<12x8x8xf32> -> vector<12x8x8xf32>
    %34 = arith.negf %33 : vector<12x8x8xf32>
    %35 = math.exp %34 : vector<12x8x8xf32>
    %cst_11 = arith.constant 1.000000e+00 : f32
    %36 = vector.broadcast %cst_11 : f32 to vector<12x8x8xf32>
    %37 = arith.addf %36, %35 : vector<12x8x8xf32>
    %38 = arith.divf %36, %37 : vector<12x8x8xf32>
    %39 = arith.addf %28, %38 : vector<12x8x8xf32>
    %40 = vector.extract_strided_slice %5 {offsets = [0, 6, 0], sizes = [12, 2, 8], strides = [1, 1, 1]} : vector<12x16x8xf32> to vector<12x2x8xf32>
    %41 = arith.truncf %40 : vector<12x2x8xf32> to vector<12x2x8xbf16>
    %42 = vector.extract_strided_slice %5 {offsets = [0, 14, 0], sizes = [12, 2, 8], strides = [1, 1, 1]} : vector<12x16x8xf32> to vector<12x2x8xf32>
    %43 = arith.truncf %42 : vector<12x2x8xf32> to vector<12x2x8xbf16>
    %cst_12 = arith.constant dense<0.000000e+00> : vector<12x8x8xf32>
    %44 = tpu.matmul %41, %43, %cst_12 {dimension_numbers = #tpu.dot_dimension_numbers<[1], [1], [2], [2], [0, 0, 0, 2, 1, 2], [0], [0]>} : vector<12x2x8xbf16>, vector<12x2x8xbf16>, vector<12x8x8xf32> -> vector<12x8x8xf32>
    %45 = arith.negf %44 : vector<12x8x8xf32>
    %46 = math.exp %45 : vector<12x8x8xf32>
    %cst_13 = arith.constant 1.000000e+00 : f32
    %47 = vector.broadcast %cst_13 : f32 to vector<12x8x8xf32>
    %48 = arith.addf %47, %46 : vector<12x8x8xf32>
    %49 = arith.divf %47, %48 : vector<12x8x8xf32>
    %50 = arith.addf %39, %49 : vector<12x8x8xf32>
    %cst_14 = arith.constant 2.500000e-01 : f32
    %51 = vector.broadcast %cst_14 : f32 to vector<12x8x8xf32>
    %52 = arith.mulf %50, %51 : vector<12x8x8xf32>
    %c0_15 = arith.constant 0 : index
    %c0_16 = arith.constant 0 : index
    %c0_17 = arith.constant 0 : index
    %c0_18 = arith.constant 0 : index
    %53 = vector.load %arg4[%c0_15, %c0_16, %c0_17, %c0_18] : memref<1x12x8x8xf32, #tpu.memory_space<vmem>>, vector<1x12x8x8xf32>
    %54 = vector.shape_cast %53 : vector<1x12x8x8xf32> to vector<12x8x8xf32>
    %55 = vector.shape_cast %52 : vector<12x8x8xf32> to vector<1x12x8x8xf32>
    tpu.vector_store %arg4[%c0_15, %c0_16, %c0_17, %c0_18], %55 {strides = array<i32>} : memref<1x12x8x8xf32, #tpu.memory_space<vmem>>, vector<1x12x8x8xf32>,
    return
  }
  func.func @transform_0(%arg0: i32, %arg1: i32) -> (i32, i32, i32, i32) {
    %c0_i32 = arith.constant 0 : i32
    %c0_i32_0 = arith.constant 0 : i32
    %c0_i32_1 = arith.constant 0 : i32
    return %arg0, %arg1, %c0_i32, %c0_i32_0 : i32, i32, i32, i32
  }
  func.func @transform_1(%arg0: i32, %arg1: i32) -> (i32, i32) {
    %c0_i32 = arith.constant 0 : i32
    %c0_i32_0 = arith.constant 0 : i32
    %c0_i32_1 = arith.constant 0 : i32
    return %c0_i32, %c0_i32_0 : i32, i32
  }
  func.func @transform_2(%arg0: i32, %arg1: i32) -> (i32, i32, i32, i32) {
    %c0_i32 = arith.constant 0 : i32
    %c0_i32_0 = arith.constant 0 : i32
    %c0_i32_1 = arith.constant 0 : i32
    return %arg0, %arg1, %c0_i32, %c0_i32_0 : i32, i32, i32, i32
  }
}

</mosaic_0001>

<bundles_post_ra>
// kernel: satt2_forward.2
= control target key start
LH: loop header
LB: loop body
LE: loop exit
PB: predicated region body
PF: predicated region fallthrough
CT: control target
= control target key end

     0   :  { %s3988_s9 = smov 0   ;;  %s3990_s10 = smov 0   ;;  %s5446_s0 = inlined_call_operand.vmem [shape: bf16[16,8], index: 0, kind: input, shape index: {}]   ;;  %s5447_s1 = inlined_call_operand.vmem [shape: bf16[2,8,8,12], index: 1, kind: input, shape index: {}]   ;;  %s5448_s2 = inlined_call_operand.vmem [shape: f32[2,12,8,8], index: 2, kind: output, shape index: {}]  }
   0x1   :  { %s3992_s11 = smov 0  }
   0x2 LB: > { %s24_s12 = sadd.s32 1, %s3967_s10  ;;  %p3479_p0 = scmp.ge.s32.totalorder %s3971_s11, 1  ;;  %s3971_s11 = sphi %s3992_s11, %s12_s11   ;;  %s3967_s10 = sphi %s3990_s10, %s5558_s10   ;;  %s3963_s9 = sphi %s3988_s9, %s5557_s9  }
   0x3   : > { %p26_p1 = scmp.ge.s32.totalorder %s24_s12, 2  ;;  %p133_p2 = scmp.lt.s32.totalorder %s3971_s11, 3 }
   0x5   : > { %s5560_s12 = smov (%p26_p1, %s24_s12), 0  ;;  %p134_p3 = pnand %p3479_p0, %p133_p2 }
   0x7   : > { %137 = sbr.rel (%p134_p3) target bundleno = 717 (0x2cd), region = 28 }
   0xc   : > { %p164_p4 = scmp.lt.s32.totalorder %s3963_s9, 1  ;;  %vm313_vm0 = vcmask 1043456   ;;  %v3607_v5 = vld [vmem:[%s5446_s0] sm:$0xff]  ;;  %vm309_vm1 = vcmask 64512   ;;  %vm562_vm2 = vcmask 1040384   ;;  %vm558_vm3 = vcmask 15360  }
   0xe   : > { %s5562_s9 = smov (!%p164_p4, %s3963_s9), 1 }
   0xf   : > { %s3658_s13 = smul.u32 48, %s5562_s9 }
  0x10   : > { %s3659_s19 = smul.u32 96, %s5562_s9 }
  0x11   : > { %s4012_s16 = scalar_lea.vmem %s5447_s1, %s3658_s13 }
  0x12   : > { %v3653_v0 = vld [vmem:[%s4012_s16 + $0x8] sm:$0xff]  ;;  %v3655_v1 = vld [vmem:[%s4012_s16 + $0x18] sm:$0xff]  ;;  %v183_v2 = vld [vmem:[%s4012_s16] sm:$0xff]   ;;  %s5206_s22 = scalar_lea.vmem %s5448_s2, %s3659_s19 }
  0x13   : > { %189 = vst [vmem:[#allocation2] sm:$0xff] %v183_v2   ;;  %v3654_v3 = vld [vmem:[%s4012_s16 + $0x10] sm:$0xff]  ;;  %v3657_v4 = vld [vmem:[%s4012_s16 + $0x28] sm:$0xff]  ;;  %v3656_v26 = vld [vmem:[%s4012_s16 + $0x20] sm:$0xff] }
  0x14   : > { %3612 = vst [vmem:[#allocation2 + $0x8] sm:$0xff] %v3653_v0  }
  0x15   : > { %3622 = vst [vmem:[#allocation2 + $0x18] sm:$0xff] %v3655_v1  }
  0x16   : > { %3617 = vst [vmem:[#allocation2 + $0x10] sm:$0xff] %v3654_v3  }
  0x17   : > { %3632 = vst [vmem:[#allocation2 + $0x28] sm:$0xff] %v3657_v4  }
  0x18   : > { %3627 = vst [vmem:[#allocation2 + $0x20] sm:$0xff] %v3656_v26  }
  0x1a   : > { %v290_v6 = vld [vmem:[#allocation2] sm:$0xf]  ;;  %v291_v7 = vld [vmem:[#allocation2 + $0x4] sm:$0xf] }
  0x1b   : > { %v292_v8 = vld [vmem:[#allocation2 + $0x8] sm:$0xf]  ;;  %v293_v9 = vld [vmem:[#allocation2 + $0xc] sm:$0xf]  ;;  %v315_v10 = vsel %vm313_vm0, %v290_v6, 0  ;;  %v332_v11 = vsel %vm313_vm0, %v291_v7, 0 }
  0x1c   : > { %v349_v12 = vsel %vm313_vm0, %v292_v8, 0  ;;  %v366_v13 = vsel %vm313_vm0, %v293_v9, 0  ;;  %v296_v14 = vld [vmem:[#allocation2 + $0x18] sm:$0xf]  ;;  %v297_v15 = vld [vmem:[#allocation2 + $0x1c] sm:$0xf]  ;;  %324 = vmatpush.bf16.msra.mxu0 %v315_v10  ;;  %341 = vmatpush.bf16.msra.mxu1 %v332_v11 }
  0x1d   : > { %358 = vmatpush.bf16.msra.mxu2 %v349_v12  ;;  %375 = vmatpush.bf16.msra.mxu3 %v366_v13  ;;  %v417_v16 = vsel %vm313_vm0, %v296_v14, 0  ;;  %v434_v17 = vsel %vm313_vm0, %v297_v15, 0  ;;  %v294_v18 = vld [vmem:[#allocation2 + $0x10] sm:$0xf]  ;;  %v295_v19 = vld [vmem:[#allocation2 + $0x14] sm:$0xf] }
  0x1e   : > { %v383_v20 = vsel %vm313_vm0, %v294_v18, 0  ;;  %v400_v21 = vsel %vm313_vm0, %v295_v19, 0  ;;  %v300_v22 = vld [vmem:[#allocation2 + $0x28] sm:$0xf]  ;;  %v301_v23 = vld [vmem:[#allocation2 + $0x2c] sm:$0xf] }
  0x1f   : > { %3497 = vmatmul.msk.bf16.vlgmr.msra.gmra.mxu0 %vm309_vm1, %v3607_v5  ;;  %3498 = vmatmul.msk.bf16.vlgmr.msra.gmra.mxu1 %vm309_vm1, %v3607_v5  ;;  %v485_v24 = vsel %vm313_vm0, %v300_v22, 0  ;;  %v502_v25 = vsel %vm313_vm0, %v301_v23, 0  ;;  %v298_v27 = vld [vmem:[#allocation2 + $0x20] sm:$0xf]  ;;  %v299_v28 = vld [vmem:[#allocation2 + $0x24] sm:$0xf] }
  0x20   : > { %3499 = vmatmul.msk.bf16.vlgmr.msra.gmra.mxu2 %vm309_vm1, %v3607_v5  ;;  %3500 = vmatmul.msk.bf16.vlgmr.msra.gmra.mxu3 %vm309_vm1, %v3607_v5  ;;  %v451_v29 = vsel %vm313_vm0, %v298_v27, 0  ;;  %v468_v30 = vsel %vm313_vm0, %v299_v28, 0 }
  0x21   : > { %426 = vmatpush.bf16.msrb.mxu2 %v417_v16  ;;  %443 = vmatpush.bf16.msrb.mxu3 %v434_v17 }
  0x22   : > { %392 = vmatpush.bf16.msrb.mxu0 %v383_v20  ;;  %409 = vmatpush.bf16.msrb.mxu1 %v400_v21 }
  0x25   : > { %494 = vmatpush.bf16.msra.mxu2 %v485_v24  ;;  %511 = vmatpush.bf16.msra.mxu3 %v502_v25 }
  0x26   : > { %460 = vmatpush.bf16.msra.mxu0 %v451_v29  ;;  %477 = vmatpush.bf16.msra.mxu1 %v468_v30 }
  0x2f   : > { %3501 = vmatmul.msk.bf16.vlgmr.msrb.gmra.mxu0 %vm309_vm1, %v3607_v5  ;;  %3502 = vmatmul.msk.bf16.vlgmr.msrb.gmra.mxu1 %vm309_vm1, %v3607_v5 }
  0x30   : > { %3503 = vmatmul.msk.bf16.vlgmr.msrb.gmra.mxu2 %vm309_vm1, %v3607_v5  ;;  %3504 = vmatmul.msk.bf16.vlgmr.msrb.gmra.mxu3 %vm309_vm1, %v3607_v5 }
  0x3f   : > { %3505 = vmatmul.msk.bf16.vlgmr.msra.gmra.mxu0 %vm309_vm1, %v3607_v5  ;;  %3506 = vmatmul.msk.bf16.vlgmr.msra.gmra.mxu1 %vm309_vm1, %v3607_v5 }
  0x40   : > { %3507 = vmatmul.msk.bf16.vlgmr.msra.gmra.mxu2 %vm309_vm1, %v3607_v5  ;;  %3508 = vmatmul.msk.bf16.vlgmr.msra.gmra.mxu3 %vm309_vm1, %v3607_v5 }
  0x9c   : > { %v326_v31 = vpop.f32.mrf.mxu0  ;;  %v343_v32 = vpop.f32.mrf.mxu1 }
  0x9d   : > { %v4081_v7 = vpack.c.bf16 %v326_v31, %v326_v31  ;;  %v4083_v8 = vpack.c.bf16 %v343_v32, %v343_v32 }
  0xa3   : > { %v360_v33 = vpop.f32.mrf.mxu2  ;;  %v377_v34 = vpop.f32.mrf.mxu3 }
  0xa4   : > { %v4047_v35 = vpack.c.bf16 %v360_v33, %v360_v33  ;;  %v4049_v36 = vpack.c.bf16 %v377_v34, %v377_v34  ;;  %v328_v37 = vpop.f32.mrf.mxu0  ;;  %v345_v38 = vpop.f32.mrf.mxu1 }
  0xa5   : > { %v530_v39 = vpack.c.bf16 %v328_v37, %v328_v37  ;;  %v531_v40 = vpack.c.bf16 %v345_v38, %v345_v38 }
  0xa6   : > { %3685 = vxpose.binary.xlu0.c.b16.start.end [1/2] (short) (narrow) %v4049_v36, %v4047_v35, 16  ;;  %v1293_v21 = vunpack.c.l.b16 %v4047_v35  ;;  %v1337_v22 = vunpack.c.l.b16 %v4049_v36 }
  0xa7   : > { %v1226_v41 = vunpack.c.l.b16 %v530_v39  ;;  %v1270_v42 = vunpack.c.l.b16 %v531_v40  ;;  %v564_v43 = vsel %vm562_vm2, %v530_v39, 0  ;;  %v599_v44 = vsel %vm562_vm2, %v531_v40, 0 }
  0xa8   : > { %573 = vmatpush.bf16.msrb.mxu0 %v564_v43  ;;  %608 = vmatpush.bf16.msrb.mxu1 %v599_v44  ;;  %v4115_v33 = vpack.c.b16 %v1293_v21, %v1293_v21  ;;  %v4117_v34 = vpack.c.b16 %v1337_v22, %v1337_v22 }
  0xa9   : > { %v1227_v45 = vpack.c.b16 %v1226_v41, %v1226_v41  ;;  %v1271_v46 = vpack.c.b16 %v1270_v42, %v1270_v42 }
  0xab   : > { %v362_v47 = vpop.f32.mrf.mxu2  ;;  %v379_v48 = vpop.f32.mrf.mxu3  ;;  %v1228_v49 = vrot.slane %v1227_v45, 1  ;;  %v1272_v50 = vrot.slane %v1271_v46, 1  ;;  %v1990_v55 = vrot.slane %v1227_v45, 2  ;;  %v2028_v56 = vrot.slane %v1271_v46, 2 }
  0xac   : > { %v532_v51 = vpack.c.bf16 %v362_v47, %v362_v47  ;;  %v533_v52 = vpack.c.bf16 %v379_v48, %v379_v48  ;;  %v4055_v53 = vpop.f32.mrf.mxu0  ;;  %v4057_v54 = vpop.f32.mrf.mxu1  ;;  %v2686_v15 = vrot.slane %v1227_v45, 3  ;;  %v2724_v16 = vrot.slane %v1271_v46, 3 }
  0xad   : > { %v4060_v57 = vsel %vm562_vm2, %v1228_v49, 0  ;;  %v4063_v58 = vsel %vm562_vm2, %v1272_v50, 0  ;;  %v4068_v63 = vsel %vm562_vm2, %v1990_v55, 0  ;;  %v4071_v0 = vsel %vm562_vm2, %v2028_v56, 0 }
  0xae   : > { %v1314_v59 = vunpack.c.l.b16 %v532_v51  ;;  %v1358_v60 = vunpack.c.l.b16 %v533_v52  ;;  %v634_v61 = vsel %vm562_vm2, %v532_v51, 0  ;;  %v669_v62 = vsel %vm562_vm2, %v533_v52, 0 }
  0xaf   : > { %643 = vmatpush.bf16.msrb.mxu2 %v634_v61  ;;  %678 = vmatpush.bf16.msrb.mxu3 %v669_v62  ;;  %v4110_v31 = vsel %vm562_vm2, %v2686_v15, 0  ;;  %v4113_v32 = vsel %vm562_vm2, %v2724_v16, 0  ;;  %v1295_v55 = vrot.slane %v4115_v33, 1  ;;  %v1339_v56 = vrot.slane %v4117_v34, 1 }
  0xb0   : > { %v4073_v1 = vpack.c.b16 %v1314_v59, %v1314_v59  ;;  %v4075_v2 = vpack.c.b16 %v1358_v60, %v1358_v60 }
  0xb2   : > { %v1316_v3 = vrot.slane %v4073_v1, 1  ;;  %v1360_v4 = vrot.slane %v4075_v2, 1  ;;  %v2066_v5 = vrot.slane %v4073_v1, 2  ;;  %v2104_v6 = vrot.slane %v4075_v2, 2 }
  0xb3   : > { %v428_v9 = vpop.f32.mrf.mxu2  ;;  %v445_v10 = vpop.f32.mrf.mxu3  ;;  %v2762_v39 = vrot.slane %v4073_v1, 3  ;;  %v2800_v40 = vrot.slane %v4075_v2, 3 }
  0xb4   : > { %v4085_v11 = vpack.c.bf16 %v428_v9, %v428_v9  ;;  %v4087_v12 = vpack.c.bf16 %v445_v10, %v445_v10  ;;  %v396_v13 = vpop.f32.mrf.mxu0  ;;  %v413_v14 = vpop.f32.mrf.mxu1  ;;  %v4090_v19 = vsel %vm562_vm2, %v1316_v3, 0  ;;  %v4093_v20 = vsel %vm562_vm2, %v1360_v4, 0 }
  0xb5   : > { %v534_v17 = vpack.c.bf16 %v396_v13, %v396_v13  ;;  %v535_v18 = vpack.c.bf16 %v413_v14, %v413_v14  ;;  %v4100_v23 = vsel %vm562_vm2, %v2066_v5, 0  ;;  %v4103_v24 = vsel %vm562_vm2, %v2104_v6, 0 }
  0xb6   : > { %3691 = vxpose.binary.xlu1.c.b16.start.end [1/2] (short) (narrow) %v4087_v12, %v4085_v11, 16  ;;  %v4142_v1 = vsel %vm562_vm2, %v2762_v39, 0  ;;  %v4145_v2 = vsel %vm562_vm2, %v2800_v40, 0  ;;  %v522_v3 = vpack.c.bf16 %v4055_v53, %v4055_v53  ;;  %v523_v4 = vpack.c.bf16 %v4057_v54, %v4057_v54 }
  0xb7   : > { %3688 = vxpose.binary.xlu0.c.b16.start.end [1/2] (short) (narrow) %v4083_v8, %v4081_v7, 16  ;;  %v1402_v25 = vunpack.c.l.b16 %v534_v17  ;;  %v1446_v26 = vunpack.c.l.b16 %v535_v18  ;;  %v704_v27 = vsel %vm562_vm2, %v534_v17, 0  ;;  %v739_v28 = vsel %vm562_vm2, %v535_v18, 0 }
  0xb8   : > { %713 = vmatpush.bf16.msra.mxu0 %v704_v27  ;;  %748 = vmatpush.bf16.msra.mxu1 %v739_v28 }
  0xb9   : > { %v1403_v29 = vpack.c.b16 %v1402_v25, %v1402_v25  ;;  %v1447_v30 = vpack.c.b16 %v1446_v26, %v1446_v26 }
  0xbb   : > { %v430_v35 = vpop.f32.mrf.mxu2  ;;  %v447_v36 = vpop.f32.mrf.mxu3  ;;  %v1404_v37 = vrot.slane %v1403_v29, 1  ;;  %v1448_v38 = vrot.slane %v1447_v30, 1  ;;  %v2142_v45 = vrot.slane %v1403_v29, 2  ;;  %v2180_v46 = vrot.slane %v1447_v30, 2 }
  0xbc   : > { %v536_v41 = vpack.c.bf16 %v430_v35, %v430_v35  ;;  %v537_v42 = vpack.c.bf16 %v447_v36, %v447_v36  ;;  %v4121_v43 = vpop.f32.mrf.mxu0  ;;  %v4123_v44 = vpop.f32.mrf.mxu1  ;;  %v2838_v5 = vrot.slane %v1403_v29, 3  ;;  %v2876_v6 = vrot.slane %v1447_v30, 3 }
  0xbd   : > { %v4126_v47 = vsel %vm562_vm2, %v1404_v37, 0  ;;  %v4129_v48 = vsel %vm562_vm2, %v1448_v38, 0  ;;  %v4136_v59 = vsel %vm562_vm2, %v2142_v45, 0  ;;  %v4139_v60 = vsel %vm562_vm2, %v2180_v46, 0 }
  0xbe   : > { %v1490_v49 = vunpack.c.l.b16 %v536_v41  ;;  %v1534_v50 = vunpack.c.l.b16 %v537_v42  ;;  %v774_v51 = vsel %vm562_vm2, %v536_v41, 0  ;;  %v809_v52 = vsel %vm562_vm2, %v537_v42, 0 }
  0xbf   : > { %783 = vmatpush.bf16.msra.mxu2 %v774_v51  ;;  %818 = vmatpush.bf16.msra.mxu3 %v809_v52  ;;  %v4152_v21 = vsel %vm562_vm2, %v2838_v5, 0  ;;  %v4155_v22 = vsel %vm562_vm2, %v2876_v6, 0  ;;  %v1381_v45 = vunpack.c.l.b16 %v522_v3 }
  0xc0   : > { %v1491_v61 = vpack.c.b16 %v1490_v49, %v1490_v49  ;;  %v1535_v62 = vpack.c.b16 %v1534_v50, %v1534_v50  ;;  %v1425_v50 = vunpack.c.l.b16 %v523_v4 }
  0xc1   : > { %v4193_v5 = vpack.c.b16 %v1381_v45, %v1381_v45 }
  0xc2   : > { %v1492_v9 = vrot.slane %v1491_v61, 1  ;;  %v1536_v10 = vrot.slane %v1535_v62, 1  ;;  %v2218_v13 = vrot.slane %v1491_v61, 2  ;;  %v2256_v14 = vrot.slane %v1535_v62, 2 }
  0xc3   : > { %v496_v15 = vpop.f32.mrf.mxu2  ;;  %v513_v16 = vpop.f32.mrf.mxu3  ;;  %v2914_v17 = vrot.slane %v1491_v61, 3  ;;  %v2952_v18 = vrot.slane %v1535_v62, 3  ;;  %v1205_v61 = vunpack.c.l.b16 %v4081_v7 }
  0xc4   : > { %v528_v53 = vpack.c.bf16 %v496_v15, %v496_v15  ;;  %v529_v25 = vpack.c.bf16 %v513_v16, %v513_v16  ;;  %v464_v26 = vpop.f32.mrf.mxu0  ;;  %v481_v54 = vpop.f32.mrf.mxu1  ;;  %v4158_v27 = vsel %vm562_vm2, %v1492_v9, 0  ;;  %v4161_v28 = vsel %vm562_vm2, %v1536_v10, 0 }
  0xc5   : > { %v4163_v29 = vpack.c.bf16 %v464_v26, %v464_v26  ;;  %v4165_v30 = vpack.c.bf16 %v481_v54, %v481_v54  ;;  %v4168_v35 = vsel %vm562_vm2, %v2218_v13, 0  ;;  %v4171_v36 = vsel %vm562_vm2, %v2256_v14, 0 }
  0xc6   : > { %3697 = vxpose.binary.xlu2.c.b16.start.end [1/2] (short) (narrow) %v529_v25, %v528_v53, 16  ;;  %v4174_v37 = vsel %vm562_vm2, %v2914_v17, 0  ;;  %v4177_v38 = vsel %vm562_vm2, %v2952_v18, 0  ;;  %v4199_v9 = vpack.c.b16 %v1425_v50, %v1425_v50  ;;  %v4203_v13 = vpack.c.b16 %v1205_v61, %v1205_v61 }
  0xc7   : > { %3703 = vxpose.binary.xlu0.c.b16.start.end [1/2] (short) (narrow) %v1339_v56, %v1295_v55, 16  ;;  %v1578_v39 = vunpack.c.l.b16 %v4163_v29  ;;  %v1622_v40 = vunpack.c.l.b16 %v4165_v30  ;;  %v1249_v55 = vunpack.c.l.b16 %v4083_v8  ;;  %v526_v8 = vpack.c.bf16 %v4121_v43, %v4121_v43 }
  0xc8   : > { %3694 = vxpose.binary.xlu1.c.b16.start.end [1/2] (short) (narrow) %v523_v4, %v522_v3, 16  ;;  %v527_v14 = vpack.c.bf16 %v4123_v44, %v4123_v44  ;;  %v1383_v18 = vrot.slane %v4193_v5, 1  ;;  %v1427_v26 = vrot.slane %v4199_v9, 1  ;;  %v1207_v44 = vrot.slane %v4203_v13, 1 }
  0xc9   : > { %v4185_v51 = vpack.c.b16 %v1578_v39, %v1578_v39  ;;  %v4187_v52 = vpack.c.b16 %v1622_v40, %v1622_v40  ;;  %v4205_v7 = vpack.c.b16 %v1249_v55, %v1249_v55  ;;  %v1645_v45 = vunpack.c.l.b16 %v528_v53 }
  0xca   : > { %v1689_v50 = vunpack.c.l.b16 %v529_v25 }
  0xcb   : > { %v498_v41 = vpop.f32.mrf.mxu2  ;;  %v515_v42 = vpop.f32.mrf.mxu3  ;;  %v2990_v4 = vrot.slane %v4185_v51, 3  ;;  %v3028_v10 = vrot.slane %v4187_v52, 3  ;;  %v1251_v40 = vrot.slane %v4205_v7, 1 }
  0xcc   : > { %v4181_v46 = vpack.c.bf16 %v498_v41, %v498_v41  ;;  %v4183_v49 = vpack.c.bf16 %v515_v42, %v515_v42  ;;  %v1469_v41 = vunpack.c.l.b16 %v4085_v11  ;;  %v1513_v42 = vunpack.c.l.b16 %v4087_v12 }
  0xcd   : > { %v4214_v17 = vsel %vm562_vm2, %v2990_v4, 0  ;;  %v4225_v43 = vsel %vm562_vm2, %v3028_v10, 0  ;;  %v1557_v11 = vunpack.c.l.b16 %v526_v8 }
  0xce   : > { %v1666_v56 = vunpack.c.l.b16 %v4181_v46  ;;  %v1710_v62 = vunpack.c.l.b16 %v4183_v49  ;;  %5449 = vst [vmem:[#allocation3_spill] sm:$0xff] %v4214_v17  ;;  %v1470_v61 = vpack.c.b16 %v1469_v41, %v1469_v41  ;;  %v1514_v55 = vpack.c.b16 %v1513_v42, %v1513_v42 }
  0xcf   : > { %5450 = vst [vmem:[#allocation4_spill] sm:$0xff] %v4225_v43  ;;  %v1558_v12 = vpack.c.b16 %v1557_v11, %v1557_v11  ;;  %v1972_v41 = vrot.slane %v4203_v13, 2  ;;  %v2010_v42 = vrot.slane %v4205_v7, 2  ;;  %v2668_v11 = vrot.slane %v4203_v13, 3 }
  0xd0   : > { %v4195_v3 = vpack.c.b16 %v1666_v56, %v1666_v56  ;;  %v4197_v6 = vpack.c.b16 %v1710_v62, %v1710_v62  ;;  %v1646_v56 = vpack.c.b16 %v1645_v45, %v1645_v45  ;;  %v1690_v62 = vpack.c.b16 %v1689_v50, %v1689_v50 }
  0xd1   : > { %v1471_v4 = vrot.slane %v1470_v61, 1  ;;  %v1515_v10 = vrot.slane %v1514_v55, 1  ;;  %v1559_v25 = vrot.slane %v1558_v12, 1  ;;  %v2200_v45 = vrot.slane %v1470_v61, 2 }
  0xd2   : > { %v3066_v15 = vrot.slane %v4195_v3, 3  ;;  %v3104_v16 = vrot.slane %v4197_v6, 3  ;;  %v1647_v43 = vrot.slane %v1646_v56, 1  ;;  %v1691_v17 = vrot.slane %v1690_v62, 1 }
  0xd3   : > { %v2238_v50 = vrot.slane %v1514_v55, 2 }
  0xd4   : > { %v4219_v54 = vsel %vm562_vm2, %v3066_v15, 0  ;;  %v4222_v39 = vsel %vm562_vm2, %v3104_v16, 0  ;;  %v2048_v15 = vrot.slane %v4115_v33, 2  ;;  %v2086_v16 = vrot.slane %v4117_v34, 2 }
  0xd6   : > { %3700 = vxpose.binary.xlu2.c.b16.start.end [1/2] (short) (narrow) %v527_v14, %v526_v8, 16  ;;  %v2744_v8 = vrot.slane %v4115_v33, 3  ;;  %v2896_v33 = vrot.slane %v1470_v61, 3 }
  0xd7   : > { %3712 = vxpose.binary.xlu0.c.b16.start.end [1/2] (short) (narrow) %v1427_v26, %v1383_v18, 16  ;;  %v1601_v18 = vunpack.c.l.b16 %v527_v14  ;;  %v2782_v14 = vrot.slane %v4117_v34, 3  ;;  %v2934_v34 = vrot.slane %v1514_v55, 3 }
  0xd8   : > { %3706 = vxpose.binary.xlu1.c.b16.start.end [1/2] (short) (narrow) %v1251_v40, %v1207_v44, 16  ;;  %v2124_v44 = vrot.slane %v4193_v5, 2  ;;  %v2162_v40 = vrot.slane %v4199_v9, 2 }
  0xd9   : > { %v1602_v53 = vpack.c.b16 %v1601_v18, %v1601_v18  ;;  %v2706_v18 = vrot.slane %v4205_v7, 3  ;;  %v949_v7 = vsel %vm562_vm2, %v4183_v49, 0  ;;  %v879_v49 = vsel %vm562_vm2, %v4165_v30, 0 }
  0xda   : > { %v1668_v30 = vrot.slane %v4195_v3, 1 }
  0xdb   : > { %v1603_v26 = vrot.slane %v1602_v53, 1 }
  0xe6   : > { %3709 = vxpose.binary.xlu2.c.b16.start.end [1/2] (short) (narrow) %v1515_v10, %v1471_v4, 16  ;;  %v2276_v4 = vrot.slane %v1558_v12, 2  ;;  %v2314_v10 = vrot.slane %v1602_v53, 2 }
  0xe7   : > { %3721 = vxpose.binary.xlu0.c.b16.start.end [1/2] (short) (narrow) %v2086_v16, %v2048_v15, 16  ;;  %v2820_v15 = vrot.slane %v4193_v5, 3  ;;  %v2858_v16 = vrot.slane %v4199_v9, 3  ;;  %v914_v9 = vsel %vm562_vm2, %v4181_v46, 0 }
  0xe8   : > { %3715 = vxpose.binary.xlu1.c.b16.start.end [1/2] (short) (narrow) %v1691_v17, %v1647_v43, 16  ;;  %v2352_v17 = vrot.slane %v1646_v56, 2  ;;  %v2390_v43 = vrot.slane %v1690_v62, 2 }
  0xf6   : > { %3718 = vxpose.binary.xlu2.c.b16.start.end [1/2] (short) (narrow) %v1603_v26, %v1559_v25, 16  ;;  %v3048_v25 = vrot.slane %v1646_v56, 3  ;;  %v3086_v26 = vrot.slane %v1690_v62, 3  ;;  %v844_v56 = vsel %vm562_vm2, %v4163_v29, 0 }
  0xf7   : > { %3730 = vxpose.binary.xlu0.c.b16.start.end [1/2] (short) (narrow) %v2162_v40, %v2124_v44, 16  ;;  %v2972_v44 = vrot.slane %v1558_v12, 3  ;;  %v3010_v40 = vrot.slane %v1602_v53, 3 }
  0xf8   : > { %3724 = vxpose.binary.xlu1.c.b16.start.end [1/2] (short) (narrow) %v2010_v42, %v1972_v41, 16 }
 0x106   : > { %3727 = vxpose.binary.xlu2.c.b16.start.end [1/2] (short) (narrow) %v2238_v50, %v2200_v45, 16 }
 0x107   : > { %3739 = vxpose.binary.xlu0.c.b16.start.end [1/2] (short) (narrow) %v2782_v14, %v2744_v8, 16  ;;  %v1580_v8 = vrot.slane %v4185_v51, 1 }
 0x108   : > { %3733 = vxpose.binary.xlu1.c.b16.start.end [1/2] (short) (narrow) %v2390_v43, %v2352_v17, 16  ;;  %v1624_v43 = vrot.slane %v4187_v52, 1 }
 0x109   : > { %v1585_v14 = vsel %vm562_vm2, %v1580_v8, 0 }
 0x116   : > { %3736 = vxpose.binary.xlu2.c.b16.start.end [1/2] (short) (narrow) %v2314_v10, %v2276_v4, 16 }
 0x117   : > { %3748 = vxpose.binary.xlu0.c.b16.start.end [1/2] (short) (narrow) %v2858_v16, %v2820_v15, 16 }
 0x118   : > { %3742 = vxpose.binary.xlu1.c.b16.start.end [1/2] (short) (narrow) %v2706_v18, %v2668_v11, 16  ;;  %v2370_v11 = vrot.slane %v4195_v3, 2 }
 0x126   : > { %3745 = vxpose.binary.xlu2.c.b16.start.end [1/2] (short) (narrow) %v2934_v34, %v2896_v33, 16  ;;  %v2294_v34 = vrot.slane %v4185_v51, 2 }
 0x128   : > { %3751 = vxpose.binary.xlu1.c.b16.start.end [1/2] (short) (narrow) %v3086_v26, %v3048_v25, 16  ;;  %v2332_v26 = vrot.slane %v4187_v52, 2 }
 0x136   : > { %3754 = vxpose.binary.xlu2.c.b16.start.end [1/2] (short) (narrow) %v3010_v40, %v2972_v44, 16 }
 0x152   : > { %v3686_v5 = vpop.trf.xlu0 }
 0x153   : > { %3511 = vmatmul.msk.bf16.vlgmr.msrb.gmra.mxu2 %vm558_vm3, %v3686_v5 }
 0x154   : > { %923 = vmatpush.bf16.msrb.mxu2 %v914_v9 }
 0x15a   : > { %v3687_v13 = vpop.trf.xlu0 }
 0x15b   : > { %3512 = vmatmul.msk.bf16.vlgmr.msrb.gmra.mxu3 %vm558_vm3, %v3687_v13 }
 0x15c   : > { %958 = vmatpush.bf16.msrb.mxu3 %v949_v7 }
 0x162   : > { %v3692_v61 = vpop.trf.xlu1 }
 0x163   : > { %v3689_v55 = vpop.trf.xlu0  ;;  %3515 = vmatmul.msk.bf16.vlgmr.msra.gmra.mxu2 %vm558_vm3, %v3692_v61 }
 0x164   : > { %3509 = vmatmul.msk.bf16.vlgmr.msrb.gmra.mxu0 %vm558_vm3, %v3689_v55  ;;  %1330 = vmatpush.bf16.msra.mxu2 %v4090_v19 }
 0x165   : > { %853 = vmatpush.bf16.msrb.mxu0 %v844_v56 }
 0x167   : > { %v3698_v46 = vpop.trf.xlu2 }
 0x16a   : > { %v3693_v62 = vpop.trf.xlu1 }
 0x16b   : > { %v3690_v12 = vpop.trf.xlu0  ;;  %3516 = vmatmul.msk.bf16.vlgmr.msra.gmra.mxu3 %vm558_vm3, %v3693_v62 }
 0x16c   : > { %3510 = vmatmul.msk.bf16.vlgmr.msrb.gmra.mxu1 %vm558_vm3, %v3690_v12  ;;  %1374 = vmatpush.bf16.msra.mxu3 %v4093_v20 }
 0x16d   : > { %888 = vmatpush.bf16.msrb.mxu1 %v879_v49 }
 0x16f   : > { %v3699_v53 = vpop.trf.xlu2 }
 0x173   : > { %3519 = vmatmul.msk.bf16.vlgmr.msrb.gmra.mxu2 %vm558_vm3, %v3698_v46  ;;  %v3704_v20 = vpop.trf.xlu0 }
 0x174   : > { %v3695_v29 = vpop.trf.xlu1  ;;  %1506 = vmatpush.bf16.msrb.mxu2 %v4158_v27  ;;  %v1673_v27 = vsel %vm562_vm2, %v1668_v30, 0 }
 0x175   : > { %3513 = vmatmul.msk.bf16.vlgmr.msra.gmra.mxu0 %vm558_vm3, %v3695_v29 }
 0x176   : > { %1242 = vmatpush.bf16.msra.mxu0 %v4060_v57  ;;  %v1712_v57 = vrot.slane %v4197_v6, 1 }
 0x177   : > { %v3701_v19 = vpop.trf.xlu2 }
 0x17b   : > { %3520 = vmatmul.msk.bf16.vlgmr.msrb.gmra.mxu3 %vm558_vm3, %v3699_v53 }
 0x17c   : > { %v3696_v41 = vpop.trf.xlu1  ;;  %1550 = vmatpush.bf16.msrb.mxu3 %v4161_v28  ;;  %v3705_v28 = vpop.trf.xlu0 }
 0x17d   : > { %3514 = vmatmul.msk.bf16.vlgmr.msra.gmra.mxu1 %vm558_vm3, %v3696_v41 }
 0x17e   : > { %1286 = vmatpush.bf16.msra.mxu1 %v4063_v58  ;;  %v1717_v58 = vsel %vm562_vm2, %v1712_v57, 0 }
 0x17f   : > { %v3702_v42 = vpop.trf.xlu2 }
 0x183   : > { %3535 = vmatmul.msk.bf16.vlgmr.msra.gmra.mxu2 %vm558_vm3, %v3704_v20 }
 0x184   : > { %1682 = vmatpush.bf16.msra.mxu2 %v1673_v27  ;;  %v3707_v45 = vpop.trf.xlu1  ;;  %v3713_v4 = vpop.trf.xlu0 }
 0x185   : > { %3517 = vmatmul.msk.bf16.vlgmr.msrb.gmra.mxu0 %vm558_vm3, %v3701_v19 }
 0x186   : > { %1418 = vmatpush.bf16.msrb.mxu0 %v4126_v47 }
 0x187   : > { %v3710_v50 = vpop.trf.xlu2 }
 0x18b   : > { %3536 = vmatmul.msk.bf16.vlgmr.msra.gmra.mxu3 %vm558_vm3, %v3705_v28 }
 0x18c   : > { %1726 = vmatpush.bf16.msra.mxu3 %v1717_v58  ;;  %v3708_v47 = vpop.trf.xlu1  ;;  %v3714_v10 = vpop.trf.xlu0 }
 0x18d   : > { %3518 = vmatmul.msk.bf16.vlgmr.msrb.gmra.mxu1 %vm558_vm3, %v3702_v42 }
 0x18e   : > { %1462 = vmatpush.bf16.msrb.mxu1 %v4129_v48  ;;  %v1629_v48 = vsel %vm562_vm2, %v1624_v43, 0  ;;  %v5451_v43 = vld [vmem:[#allocation3_spill] sm:$0xff] }
 0x18f   : > { %v3711_v17 = vpop.trf.xlu2 }
 0x193   : > { %3539 = vmatmul.msk.bf16.vlgmr.msrb.gmra.mxu2 %vm558_vm3, %v3710_v50 }
 0x194   : > { %2080 = vmatpush.bf16.msrb.mxu2 %v4100_v23  ;;  %v3716_v23 = vpop.trf.xlu1 }
 0x195   : > { %3533 = vmatmul.msk.bf16.vlgmr.msra.gmra.mxu0 %vm558_vm3, %v3707_v45 }
 0x196   : > { %1594 = vmatpush.bf16.msra.mxu0 %v1585_v14 }
 0x197   : > { %v3719_v16 = vpop.trf.xlu2 }
 0x19b   : > { %3540 = vmatmul.msk.bf16.vlgmr.msrb.gmra.mxu3 %vm558_vm3, %v3711_v17 }
 0x19c   : > { %2118 = vmatpush.bf16.msrb.mxu3 %v4103_v24  ;;  %v3717_v15 = vpop.trf.xlu1  ;;  %v3722_v24 = vpop.trf.xlu0 }
 0x19d   : > { %3534 = vmatmul.msk.bf16.vlgmr.msra.gmra.mxu1 %vm558_vm3, %v3708_v47 }
 0x19e   : > { %1638 = vmatpush.bf16.msra.mxu1 %v1629_v48 }
 0x19f   : > { %v3720_v18 = vpop.trf.xlu2 }
 0x1a3   : > { %3543 = vmatmul.msk.bf16.vlgmr.msra.gmra.mxu2 %vm558_vm3, %v3716_v23 }
 0x1a4   : > { %2232 = vmatpush.bf16.msra.mxu2 %v4168_v35  ;;  %v2375_v35 = vsel %vm562_vm2, %v2370_v11, 0  ;;  %v3725_v33 = vpop.trf.xlu1 }
 0x1a5   : > { %3537 = vmatmul.msk.bf16.vlgmr.msrb.gmra.mxu0 %vm558_vm3, %v3713_v4 }
 0x1a6   : > { %2004 = vmatpush.bf16.msrb.mxu0 %v4068_v63  ;;  %v2408_v63 = vrot.slane %v4197_v6, 2  ;;  %v2299_v6 = vsel %vm562_vm2, %v2294_v34, 0 }
 0x1a7   : > { %v3728_v3 = vpop.trf.xlu2 }
 0x1ab   : > { %3544 = vmatmul.msk.bf16.vlgmr.msra.gmra.mxu3 %vm558_vm3, %v3717_v15 }
 0x1ac   : > { %2270 = vmatpush.bf16.msra.mxu3 %v4171_v36  ;;  %v3723_v36 = vpop.trf.xlu0 }
 0x1ad   : > { %3538 = vmatmul.msk.bf16.vlgmr.msrb.gmra.mxu1 %vm558_vm3, %v3714_v10 }
 0x1ae   : > { %2042 = vmatpush.bf16.msrb.mxu1 %v4071_v0  ;;  %v2413_v0 = vsel %vm562_vm2, %v2408_v63, 0 }
 0x1af   : > { %v3729_v25 = vpop.trf.xlu2 }
 0x1b3   : > { %3559 = vmatmul.msk.bf16.vlgmr.msrb.gmra.mxu2 %vm558_vm3, %v3722_v24 }
 0x1b4   : > { %2384 = vmatpush.bf16.msrb.mxu2 %v2375_v35  ;;  %v3731_v44 = vpop.trf.xlu0 }
 0x1b5   : > { %3541 = vmatmul.msk.bf16.vlgmr.msra.gmra.mxu0 %vm558_vm3, %v3719_v16 }
 0x1b6   : > { %2156 = vmatpush.bf16.msra.mxu0 %v4136_v59  ;;  %v3726_v59 = vpop.trf.xlu1 }
 0x1b7   : > { %v3737_v5 = vpop.trf.xlu2 }
 0x1bb   : > { %3560 = vmatmul.msk.bf16.vlgmr.msrb.gmra.mxu3 %vm558_vm3, %v3723_v36 }
 0x1bc   : > { %2422 = vmatpush.bf16.msrb.mxu3 %v2413_v0  ;;  %v3732_v51 = vpop.trf.xlu0 }
 0x1bd   : > { %3542 = vmatmul.msk.bf16.vlgmr.msra.gmra.mxu1 %vm558_vm3, %v3720_v18 }
 0x1be   : > { %2194 = vmatpush.bf16.msra.mxu1 %v4139_v60  ;;  %v2337_v60 = vsel %vm562_vm2, %v2332_v26, 0  ;;  %v5452_v26 = vld [vmem:[#allocation4_spill] sm:$0xff] }
 0x1c3   : > { %3563 = vmatmul.msk.bf16.vlgmr.msra.gmra.mxu2 %vm558_vm3, %v3728_v3 }
 0x1c4   : > { %2776 = vmatpush.bf16.msra.mxu2 %v4142_v1  ;;  %v3734_v1 = vpop.trf.xlu1 }
 0x1c5   : > { %3557 = vmatmul.msk.bf16.vlgmr.msrb.gmra.mxu0 %vm558_vm3, %v3725_v33 }
 0x1c6   : > { %2308 = vmatpush.bf16.msrb.mxu0 %v2299_v6 }
 0x1cb   : > { %3564 = vmatmul.msk.bf16.vlgmr.msra.gmra.mxu3 %vm558_vm3, %v3729_v25 }
 0x1cc   : > { %2814 = vmatpush.bf16.msra.mxu3 %v4145_v2  ;;  %v3735_v40 = vpop.trf.xlu1  ;;  %v3740_v2 = vpop.trf.xlu0 }
 0x1cd   : > { %3558 = vmatmul.msk.bf16.vlgmr.msrb.gmra.mxu1 %vm558_vm3, %v3726_v59 }
 0x1ce   : > { %2346 = vmatpush.bf16.msrb.mxu1 %v2337_v60 }
 0x1d3   : > { %3567 = vmatmul.msk.bf16.vlgmr.msrb.gmra.mxu2 %vm558_vm3, %v3734_v1 }
 0x1d4   : > { %2928 = vmatpush.bf16.msrb.mxu2 %v4174_v37  ;;  %v3741_v12 = vpop.trf.xlu0  ;;  %v3743_v49 = vpop.trf.xlu1 }
 0x1d5   : > { %3561 = vmatmul.msk.bf16.vlgmr.msra.gmra.mxu0 %vm558_vm3, %v3731_v44 }
 0x1d6   : > { %2700 = vmatpush.bf16.msra.mxu0 %v4110_v31  ;;  %v645_v52 = vpop.f32.mrf.mxu2  ;;  %v3738_v31 = vpop.trf.xlu2 }
 0x1d7   : > { %v3523_v9 = vmul.f32 -1.442695, %v645_v52 }
 0x1d9   : > { %3757 = vpow2.f32 %v3523_v9 }
 0x1db   : > { %3568 = vmatmul.msk.bf16.vlgmr.msrb.gmra.mxu3 %vm558_vm3, %v3735_v40 }
 0x1dc   : > { %2966 = vmatpush.bf16.msrb.mxu3 %v4177_v38  ;;  %v3744_v47 = vpop.trf.xlu1  ;;  %v3749_v40 = vpop.trf.xlu0 }
 0x1dd   : > { %3562 = vmatmul.msk.bf16.vlgmr.msra.gmra.mxu1 %vm558_vm3, %v3732_v51 }
 0x1de   : > { %2738 = vmatpush.bf16.msra.mxu1 %v4113_v32  ;;  %v647_v13 = vpop.f32.mrf.mxu2  ;;  %v680_v37 = vpop.f32.mrf.mxu3 }
 0x1df   : > { %v3524_v7 = vmul.f32 -1.442695, %v680_v37  ;;  %v3758_v55 = vpop.eup %3757 }
 0x1e0   : > { %v4327_v62 = vadd.f32 1.0, %v3758_v55 }
 0x1e1   : > { %v575_v61 = vpop.f32.mrf.mxu0  ;;  %3759 = vpow2.f32 %v3524_v7 }
 0x1e2   : > { %v3521_v56 = vmul.f32 -1.442695, %v575_v61  ;;  %v1051_v3 = vand.u32 2147483647, %v4327_v62  ;;  %v1053_v6 = vand.u32 2147483648, %v4327_v62  ;;  %vm1047_vm4 = vweird.f32 %v4327_v62 }
 0x1e3   : > { %3583 = vmatmul.msk.bf16.vlgmr.msra.gmra.mxu2 %vm558_vm3, %v3740_v2 }
 0x1e4   : > { %3080 = vmatpush.bf16.msra.mxu2 %v4219_v54  ;;  %3761 = vpow2.f32 %v3521_v56  ;;  %v3752_v34 = vpop.trf.xlu1  ;;  %vm4377_vm5 = vcmp.eq.f32.partialorder %v1051_v3, 8.507059e+37 }
 0x1e5   : > { %3565 = vmatmul.msk.bf16.vlgmr.msrb.gmra.mxu0 %vm558_vm3, %v3737_v5  ;;  %3763 = vrcp.f32 %v4327_v62 }
 0x1e6   : > { %2852 = vmatpush.bf16.msrb.mxu0 %v4152_v21  ;;  %v682_v38 = vpop.f32.mrf.mxu3  ;;  %v785_v46 = vpop.f32.mrf.mxu2 }
 0x1e7   : > { %v3527_v32 = vmul.f32 -1.442695, %v785_v46  ;;  %v3760_v19 = vpop.eup %3759  ;;  %v3746_v21 = vpop.trf.xlu2 }
 0x1e8   : > { %v4333_v20 = vadd.f32 1.0, %v3760_v19 }
 0x1e9   : > { %v577_v53 = vpop.f32.mrf.mxu0  ;;  %v610_v29 = vpop.f32.mrf.mxu1  ;;  %3765 = vpow2.f32 %v3527_v32 }
 0x1ea   : > { %v3522_v41 = vmul.f32 -1.442695, %v610_v29  ;;  %v3762_v54 = vpop.eup %3761  ;;  %v1066_v13 = vand.u32 2147483647, %v4333_v20  ;;  %v1068_v37 = vand.u32 2147483648, %v4333_v20  ;;  %vm1062_vm7 = vweird.f32 %v4333_v20 }
 0x1eb   : > { %3584 = vmatmul.msk.bf16.vlgmr.msra.gmra.mxu3 %vm558_vm3, %v3741_v12  ;;  %v4336_v57 = vpop.eup %3763  ;;  %v4338_v28 = vadd.f32 1.0, %v3762_v54 }
 0x1ec   : > { %3118 = vmatpush.bf16.msra.mxu3 %v4222_v39  ;;  %3767 = vpow2.f32 %v3522_v41  ;;  %v1043_v14 = vmul.f32 %v4336_v57, %v4327_v62  ;;  %vm1048_vm6 = vweird.f32 %v4336_v57  ;;  %vm4407_vm9 = vcmp.eq.f32.partialorder %v1066_v13, 8.507059e+37 }
 0x1ed   : > { %3566 = vmatmul.msk.bf16.vlgmr.msrb.gmra.mxu1 %vm558_vm3, %v3738_v31  ;;  %v1054_v31 = vor.u32 1.1754944e-38, %v1053_v6  ;;  %v1021_v29 = vand.u32 2147483647, %v4338_v28  ;;  %v1023_v19 = vand.u32 2147483648, %v4338_v28  ;;  %vm4403_vm8 = vmor %vm1047_vm4, %vm1048_vm6  ;;  %vm1017_vm11 = vweird.f32 %v4338_v28 }
 0x1ee   : > { %2890 = vmatpush.bf16.msrb.mxu1 %v4155_v22  ;;  %v787_v30 = vpop.f32.mrf.mxu2  ;;  %v820_v27 = vpop.f32.mrf.mxu3  ;;  %v1044_v11 = vsub.f32 1.0, %v1043_v14 }
 0x1ef   : > { %v3528_v42 = vmul.f32 -1.442695, %v820_v27  ;;  %v3766_v58 = vpop.eup %3765  ;;  %v3747_v16 = vpop.trf.xlu2  ;;  %v1069_v30 = vor.u32 1.1754944e-38, %v1068_v37  ;;  %vm4424_vm12 = vcmp.eq.f32.partialorder %v1021_v29, 8.507059e+37 }
 0x1f0   : > { %v4343_v22 = vadd.f32 1.0, %v3766_v58  ;;  %v1045_v59 = vmul.f32 %v4336_v57, %v1044_v11 }
 0x1f1   : > { %3769 = vpow2.f32 %v3528_v42  ;;  %v612_v45 = vpop.f32.mrf.mxu1 }
 0x1f2   : > { %3771 = vrcp.f32 %v4333_v20  ;;  %v715_v39 = vpop.f32.mrf.mxu0  ;;  %v3768_v50 = vpop.eup %3767  ;;  %v1046_v61 = vadd.f32 %v4336_v57, %v1045_v59  ;;  %v1113_v14 = vand.u32 2147483648, %v4343_v22  ;;  %vm1107_vm15 = vweird.f32 %v4343_v22 }
 0x1f3   : > { %v3525_v8 = vmul.f32 -1.442695, %v715_v39  ;;  %3587 = vmatmul.msk.bf16.vlgmr.msrb.gmra.mxu2 %vm558_vm3, %v3746_v21  ;;  %3773 = vrcp.f32 %v4338_v28  ;;  %v4348_v17 = vadd.f32 1.0, %v3768_v50 }
 0x1f4   : > { %v1050_v42 = vsel %vm4403_vm8, %v4336_v57, %v1046_v61  ;;  %v1024_v57 = vor.u32 1.1754944e-38, %v1023_v19 }
 0x1f5   : > { %3581 = vmatmul.msk.bf16.vlgmr.msra.gmra.mxu0 %vm558_vm3, %v3743_v49  ;;  %3775 = vpow2.f32 %v3525_v8  ;;  %vm1032_vm4 = vweird.f32 %v4348_v17 }
 0x1f6   : > { %3004 = vmatpush.bf16.msra.mxu0 %v5451_v43  ;;  %v822_v4 = vpop.f32.mrf.mxu3  ;;  %v925_v48 = vpop.f32.mrf.mxu2  ;;  %3777 = vrcp.f32 %v4343_v22 }
 0x1f7   : > { %v3770_v23 = vpop.eup %3769  ;;  %v3531_v10 = vmul.f32 -1.442695, %v925_v48  ;;  %3779 = vrcp.f32 %v4348_v17  ;;  %v3753_v48 = vpop.trf.xlu1 }
 0x1f8   : > { %v4351_v15 = vpop.eup %3771  ;;  %v4354_v24 = vadd.f32 1.0, %v3770_v23 }
 0x1f9   : > { %v4357_v63 = vpop.eup %3773  ;;  %v1058_v36 = vmul.f32 %v4351_v15, %v4333_v20  ;;  %3781 = vpow2.f32 %v3531_v10  ;;  %vm1063_vm10 = vweird.f32 %v4351_v15  ;;  %v1111_v10 = vand.u32 2147483647, %v4343_v22 }
 0x1fa   : > { %v717_v35 = vpop.f32.mrf.mxu0  ;;  %v750_v18 = vpop.f32.mrf.mxu1  ;;  %3783 = vrcp.f32 %v4354_v24  ;;  %v1013_v25 = vmul.f32 %v4357_v63, %v4338_v28  ;;  %vm4442_vm13 = vmor %vm1062_vm7, %vm1063_vm10  ;;  %vm1018_vm14 = vweird.f32 %v4357_v63  ;;  %v1126_v2 = vand.u32 2147483647, %v4354_v24 }
 0x1fb   : > { %3588 = vmatmul.msk.bf16.vlgmr.msrb.gmra.mxu3 %vm558_vm3, %v3747_v16  ;;  %v3526_v33 = vmul.f32 -1.442695, %v750_v18  ;;  %v3776_v0 = vpop.eup %3775  ;;  %v1059_v51 = vsub.f32 1.0, %v1058_v36  ;;  %v1038_v16 = vand.u32 2147483648, %v4348_v17  ;;  %v3750_v35 = vpop.trf.xlu0  ;;  %v4436_v18 = vsel %vm4377_vm5, %v1054_v31, %v1050_v42  ;;  %vm4466_vm0 = vmor %vm1017_vm11, %vm1018_vm14 }
 0x1fc   : > { %v4370_v1 = vpop.eup %3777  ;;  %v4372_v52 = vadd.f32 1.0, %v3776_v0  ;;  %v1014_v55 = vsub.f32 1.0, %v1013_v25  ;;  %v1036_v0 = vand.u32 2147483647, %v4348_v17  ;;  %vm4470_vm2 = vcmp.eq.f32.partialorder %v1111_v10, 8.507059e+37 }
 0x1fd   : > { %3582 = vmatmul.msk.bf16.vlgmr.msra.gmra.mxu1 %vm558_vm3, %v3744_v47  ;;  %3785 = vpow2.f32 %v3526_v33  ;;  %v4374_v5 = vpop.eup %3779  ;;  %v1060_v32 = vmul.f32 %v4351_v15, %v1059_v51  ;;  %v1103_v12 = vmul.f32 %v4370_v1, %v4343_v22  ;;  %vm1108_vm5 = vweird.f32 %v4370_v1 }
 0x1fe   : > { %3042 = vmatpush.bf16.msra.mxu1 %v5452_v26  ;;  %v927_v44 = vpop.f32.mrf.mxu2  ;;  %v960_v60 = vpop.f32.mrf.mxu3  ;;  %3787 = vrcp.f32 %v4372_v52  ;;  %v1028_v41 = vmul.f32 %v4374_v5, %v4348_v17  ;;  %v1015_v62 = vmul.f32 %v4357_v63, %v1014_v55  ;;  %v1114_v26 = vor.u32 1.1754944e-38, %v1113_v14  ;;  %vm4514_vm10 = vmor %vm1107_vm15, %vm1108_vm5 }
 0x1ff   : > { %v3782_v9 = vpop.eup %3781  ;;  %v3532_v7 = vmul.f32 -1.442695, %v960_v60  ;;  %v1061_v39 = vadd.f32 %v4351_v15, %v1060_v32  ;;  %v1104_v50 = vsub.f32 1.0, %v1103_v12  ;;  %vm4485_vm6 = vcmp.eq.f32.partialorder %v1036_v0, 8.507059e+37  ;;  %v3755_v32 = vpop.trf.xlu2 }
 0x200   : > { %v4385_v46 = vpop.eup %3783  ;;  %v4391_v49 = vadd.f32 1.0, %v3782_v9  ;;  %v1029_v43 = vsub.f32 1.0, %v1028_v41  ;;  %v1016_v33 = vadd.f32 %v4357_v63, %v1015_v62  ;;  %v1039_v9 = vor.u32 1.1754944e-38, %v1038_v16 }
 0x201   : > { %3789 = vpow2.f32 %v3532_v7  ;;  %v1118_v8 = vmul.f32 %v4385_v46, %v4354_v24  ;;  %v1065_v6 = vsel %vm4442_vm13, %v4351_v15, %v1061_v39  ;;  %v1105_v20 = vmul.f32 %v4370_v1, %v1104_v50 }
 0x202   : > { %v752_v56 = vpop.f32.mrf.mxu1  ;;  %v855_v38 = vpop.f32.mrf.mxu0  ;;  %3791 = vrcp.f32 %v4391_v49  ;;  %v1030_v44 = vmul.f32 %v4374_v5, %v1029_v43  ;;  %v4479_v13 = vsel %vm4407_vm9, %v1069_v30, %v1065_v6  ;;  %v1020_v28 = vsel %vm4466_vm0, %v4357_v63, %v1016_v33 }
 0x203   : > { %3591 = vmatmul.msk.bf16.vlgmr.msra.gmra.mxu2 %vm558_vm3, %v3752_v34  ;;  %v3786_v53 = vpop.eup %3785  ;;  %v3529_v11 = vmul.f32 -1.442695, %v855_v38  ;;  %v1119_v25 = vsub.f32 1.0, %v1118_v8  ;;  %v1106_v56 = vadd.f32 %v4370_v1, %v1105_v20  ;;  %vm1122_vm7 = vweird.f32 %v4354_v24 }
 0x204   : > { %v4411_v27 = vadd.f32 1.0, %v3786_v53  ;;  %v4429_v23 = vpop.eup %3787  ;;  %v1128_v63 = vand.u32 2147483648, %v4354_v24  ;;  %v1031_v12 = vadd.f32 %v4374_v5, %v1030_v44  ;;  %vm1033_vm8 = vweird.f32 %v4374_v5 }
 0x205   : > { %3585 = vmatmul.msk.bf16.vlgmr.msrb.gmra.mxu0 %vm558_vm3, %v3749_v40  ;;  %v1073_v60 = vmul.f32 %v4429_v23, %v4372_v52  ;;  %v1120_v38 = vmul.f32 %v4385_v46, %v1119_v25  ;;  %v4503_v41 = vsel %vm4424_vm12, %v1024_v57, %v1020_v28  ;;  %vm4505_vm9 = vcmp.eq.f32.partialorder %v1126_v2, 8.507059e+37  ;;  %vm4531_vm11 = vmor %vm1032_vm4, %vm1033_vm8 }
 0x206   : > { %v962_v45 = vpop.f32.mrf.mxu3  ;;  %v1332_v58 = vpop.f32.mrf.mxu2  ;;  %3793 = vrcp.f32 %v4411_v27  ;;  %v1081_v54 = vand.u32 2147483647, %v4372_v52  ;;  %v1083_v62 = vand.u32 2147483648, %v4372_v52  ;;  %v1110_v22 = vsel %vm4514_vm10, %v4370_v1, %v1106_v56 }
 0x207   : > { %v3547_v4 = vmul.f32 -1.442695, %v1332_v58  ;;  %v3790_v59 = vpop.eup %3789  ;;  %v1074_v53 = vsub.f32 1.0, %v1073_v60  ;;  %v1121_v57 = vadd.f32 %v4385_v46, %v1120_v38  ;;  %vm1123_vm12 = vweird.f32 %v4385_v46  ;;  %v3756_v15 = vpop.trf.xlu2 }
 0x208   : > { %v4460_v51 = vpop.eup %3791  ;;  %v4489_v7 = vadd.f32 1.0, %v3790_v59  ;;  %v1035_v14 = vsel %vm4531_vm11, %v4374_v5, %v1031_v12  ;;  %vm1077_vm13 = vweird.f32 %v4372_v52  ;;  %v1173_v17 = vand.u32 2147483648, %v4391_v49  ;;  %vm4551_vm14 = vmor %vm1122_vm7, %vm1123_vm12 }
 0x209   : > { %3795 = vpow2.f32 %v3547_v4  ;;  %v1163_v29 = vmul.f32 %v4460_v51, %v4391_v49  ;;  %v1075_v43 = vmul.f32 %v4429_v23, %v1074_v53  ;;  %v1129_v4 = vor.u32 1.1754944e-38, %v1128_v63 }
 0x20a   : > { %v857_v3 = vpop.f32.mrf.mxu0  ;;  %v4449_v34 = vpop.f32.mrf.mxu1  ;;  %3797 = vpow2.f32 %v3529_v11  ;;  %v4547_v10 = vsel %vm4470_vm2, %v1114_v26, %v1110_v22  ;;  %v4555_v16 = vor.u32 1.1754944e-38, %v1083_v62  ;;  %v4561_v0 = vsel %vm4485_vm6, %v1039_v9, %v1035_v14 }
 0x20b   : > { %3592 = vmatmul.msk.bf16.vlgmr.msra.gmra.mxu3 %vm558_vm3, %v3753_v48  ;;  %3799 = vrcp.f32 %v4489_v7  ;;  %v1164_v1 = vsub.f32 1.0, %v1163_v29  ;;  %v1125_v3 = vsel %vm4551_vm14, %v4385_v46, %v1121_v57  ;;  %vm1167_vm15 = vweird.f32 %v4391_v49 }
 0x20c   : > { %v4491_v55 = vpop.eup %3793  ;;  %v1171_v24 = vand.u32 2147483647, %v4391_v49  ;;  %v3530_v59 = vmul.f32 -1.442695, %v4449_v34  ;;  %v1076_v20 = vadd.f32 %v4429_v23, %v1075_v43  ;;  %vm1078_vm0 = vweird.f32 %v4429_v23 }
 0x20d   : > { %3586 = vmatmul.msk.bf16.vlgmr.msrb.gmra.mxu1 %vm558_vm3, %v3750_v35  ;;  %v1088_v45 = vmul.f32 %v4491_v55, %v4411_v27  ;;  %vm4573_vm2 = vcmp.eq.f32.partialorder %v1081_v54, 8.507059e+37  ;;  %v1165_v26 = vmul.f32 %v4460_v51, %v1164_v1  ;;  %v4578_v44 = vor.u32 1.1754944e-38, %v1173_v17  ;;  %vm4593_vm5 = vmor %vm1077_vm13, %vm1078_vm0 }
 0x20e   : > { %v1334_v61 = vpop.f32.mrf.mxu2  ;;  %v1376_v31 = vpop.f32.mrf.mxu3  ;;  %vm1092_vm4 = vweird.f32 %v4411_v27  ;;  %v1096_v34 = vand.u32 2147483647, %v4411_v27  ;;  %v4584_v9 = vsel %vm4505_vm9, %v1129_v4, %v1125_v3  ;;  %v1098_v28 = vand.u32 2147483648, %v4411_v27 }
 0x20f   : > { %v3796_v19 = vpop.eup %3795  ;;  %v3548_v30 = vmul.f32 -1.442695, %v1376_v31  ;;  %v1089_v11 = vsub.f32 1.0, %v1088_v45  ;;  %vm1168_vm6 = vweird.f32 %v4460_v51  ;;  %v1188_v56 = vand.u32 2147483648, %v4489_v7 }
 0x210   : > { %v4522_v58 = vadd.f32 1.0, %v3796_v19  ;;  %v3798_v8 = vpop.eup %3797  ;;  %v1080_v63 = vsel %vm4593_vm5, %v4429_v23, %v1076_v20  ;;  %vm4604_vm7 = vcmp.eq.f32.partialorder %v1171_v24, 8.507059e+37  ;;  %vm1093_vm8 = vweird.f32 %v4491_v55 }
 0x211   : > { %3801 = vpow2.f32 %v3548_v30  ;;  %v4557_v35 = vadd.f32 1.0, %v3798_v8  ;;  %v4569_v6 = vpop.eup %3799  ;;  %v1090_v2 = vmul.f32 %v4491_v55, %v1089_v11  ;;  %vm4611_vm9 = vcmp.eq.f32.partialorder %v1096_v34, 8.507059e+37  ;;  %vm4648_vm12 = vmor %vm1092_vm4, %vm1093_vm8 }
 0x212   : > { %v892_v39 = vpop.f32.mrf.mxu1  ;;  %v1244_v50 = vpop.f32.mrf.mxu0  ;;  %3803 = vrcp.f32 %v4522_v58  ;;  %v1178_v29 = vmul.f32 %v4569_v6, %v4489_v7  ;;  %vm1815_vm10 = vweird.f32 %v4522_v58  ;;  %v1821_v30 = vand.u32 2147483648, %v4522_v58 }
 0x213   : > { %v3545_v48 = vmul.f32 -1.442695, %v1244_v50  ;;  %v1091_v54 = vadd.f32 %v4491_v55, %v1090_v2  ;;  %v1819_v39 = vand.u32 2147483647, %v4522_v58  ;;  %v1099_v47 = vor.u32 1.1754944e-38, %v1098_v28 }
 0x214   : > { %v1186_v57 = vand.u32 2147483647, %v4489_v7  ;;  %v4639_v1 = vsel %vm4573_vm2, %v4555_v16, %v1080_v63  ;;  %v4652_v17 = vor.u32 1.1754944e-38, %v1188_v56  ;;  %v1179_v16 = vsub.f32 1.0, %v1178_v29 }
 0x215   : > { %3589 = vmatmul.msk.bf16.vlgmr.msra.gmra.mxu0 %vm558_vm3, %v3755_v32  ;;  %3805 = vpow2.f32 %v3545_v48  ;;  %v1166_v32 = vadd.f32 %v4460_v51, %v1165_v26  ;;  %v1095_v5 = vsel %vm4648_vm12, %v4491_v55, %v1091_v54  ;;  %vm1820_vm14 = vcmp.eq.f32.partialorder %v1819_v39, 8.507059e+37 }
 0x216   : > { %v1378_v36 = vpop.f32.mrf.mxu3  ;;  %v1508_v33 = vpop.f32.mrf.mxu2  ;;  %3807 = vrcp.f32 %v4557_v35  ;;  %v1141_v26 = vand.u32 2147483647, %v4557_v35 }
 0x217   : > { %v3802_v46 = vpop.eup %3801  ;;  %v3551_v60 = vmul.f32 -1.442695, %v1508_v33  ;;  %3809 = vpow2.f32 %v3530_v59 }
 0x218   : > { %v3804_v40 = vpop.eup %3803  ;;  %v4609_v52 = vadd.f32 1.0, %v3802_v46 }
 0x219   : > { %v1811_v38 = vmul.f32 %v3804_v40, %v4522_v58  ;;  %3811 = vpow2.f32 %v3551_v60  ;;  %vm1816_vm11 = vweird.f32 %v3804_v40 }
 0x21a   : > { %v1246_v37 = vpop.f32.mrf.mxu0  ;;  %v1288_v61 = vpop.f32.mrf.mxu1  ;;  %3813 = vrcp.f32 %v4609_v52  ;;  %vm1817_vm13 = vmor %vm1815_vm10, %vm1816_vm11  ;;  %v1834_v2 = vand.u32 2147483647, %v4609_v52 }
 0x21b   : > { %v1812_v19 = vsub.f32 1.0, %v1811_v38  ;;  %v3546_v23 = vmul.f32 -1.442695, %v1288_v61  ;;  %v3806_v21 = vpop.eup %3805  ;;  %v1836_v61 = vand.u32 2147483648, %v4609_v52 }
 0x21c   : > { %v4623_v50 = vadd.f32 1.0, %v3806_v21  ;;  %v4625_v8 = vpop.eup %3807  ;;  %vm4697_vm2 = vcmp.eq.f32.partialorder %v1834_v2, 8.507059e+37 }
 0x21d   : > { %3590 = vmatmul.msk.bf16.vlgmr.msra.gmra.mxu1 %vm558_vm3, %v3756_v15  ;;  %v1813_v45 = vmul.f32 %v3804_v40, %v1812_v19  ;;  %vm4631_vm3 = vmor %vm1167_vm15, %vm1168_vm6  ;;  %3815 = vpow2.f32 %v3546_v23  ;;  %v3810_v43 = vpop.eup %3809  ;;  %v4663_v59 = vmul.f32 %v4625_v8, %v4557_v35  ;;  %v4681_v15 = vsel %vm4611_vm9, %v1099_v47, %v1095_v5 }
 0x21e   : > { %v1510_v42 = vpop.f32.mrf.mxu2  ;;  %v1552_v62 = vpop.f32.mrf.mxu3  ;;  %v1170_v4 = vsel %vm4631_vm3, %v4460_v51, %v1166_v32  ;;  %v1822_v51 = vor.u32 1.1754944e-38, %v1821_v30  ;;  %3817 = vrcp.f32 %v4623_v50  ;;  %v4665_v20 = vadd.f32 1.0, %v3810_v43 }
 0x21f   : > { %v3552_v14 = vmul.f32 -1.442695, %v1552_v62  ;;  %v1814_v48 = vadd.f32 %v3804_v40, %v1813_v45  ;;  %v3812_v36 = vpop.eup %3811  ;;  %v4672_v25 = vsel %vm4604_vm7, %v4578_v44, %v1170_v4  ;;  %v1134_v56 = vsub.f32 1.0, %v4663_v59 }
 0x220   : > { %v3814_v24 = vpop.eup %3813  ;;  %v4667_v58 = vadd.f32 1.0, %v3812_v36  ;;  %v1789_v38 = vand.u32 2147483647, %v4623_v50  ;;  %vm1830_vm15 = vweird.f32 %v4609_v52  ;;  %v1791_v23 = vand.u32 2147483648, %v4623_v50 }
 0x221   : > { %v1818_v33 = vsel %vm1817_vm13, %v3804_v40, %v1814_v48  ;;  %3819 = vpow2.f32 %v3552_v14  ;;  %v1826_v34 = vmul.f32 %v3814_v24, %v4609_v52  ;;  %v1180_v40 = vmul.f32 %v4569_v6, %v1179_v16 }
 0x222   : > { %v1290_v27 = vpop.f32.mrf.mxu1  ;;  %v1420_v11 = vpop.f32.mrf.mxu0  ;;  %v1823_v55 = vsel %vm1820_vm14, %v1822_v51, %v1818_v33  ;;  %3821 = vrcp.f32 %v4667_v58  ;;  %vm1831_vm0 = vweird.f32 %v3814_v24  ;;  %v1837_v42 = vor.u32 1.1754944e-38, %v1836_v61 }
 0x223   : > { %v3549_v3 = vmul.f32 -1.442695, %v1420_v11  ;;  %v4676_v46 = vadd.f32 %v1823_v55, %v4436_v18  ;;  %v3816_v60 = vpop.eup %3815  ;;  %v1827_v37 = vsub.f32 1.0, %v1826_v34  ;;  %v4695_v29 = vadd.f32 %v4569_v6, %v1180_v40  ;;  %vm1832_vm4 = vmor %vm1830_vm15, %vm1831_vm0 }
 0x224   : > { %v4687_v18 = vadd.f32 1.0, %v3816_v60  ;;  %v3818_v31 = vpop.eup %3817  ;;  %vm1785_vm5 = vweird.f32 %v4623_v50  ;;  %vm4706_vm6 = vcmp.eq.f32.partialorder %v1789_v38, 8.507059e+37  ;;  %v1792_v5 = vor.u32 1.1754944e-38, %v1791_v23 }
 0x225   : > { %3823 = vpow2.f32 %v3549_v3  ;;  %v1828_v12 = vmul.f32 %v3814_v24, %v1827_v37  ;;  %v1781_v53 = vmul.f32 %v3818_v31, %v4623_v50  ;;  %vm1786_vm7 = vweird.f32 %v3818_v31 }
 0x226   : > { %v1554_v44 = vpop.f32.mrf.mxu3  ;;  %v1684_v28 = vpop.f32.mrf.mxu2  ;;  %3825 = vrcp.f32 %v4665_v20  ;;  %v1879_v16 = vand.u32 2147483647, %v4667_v58  ;;  %vm1875_vm8 = vweird.f32 %v4667_v58  ;;  %vm1787_vm9 = vmor %vm1785_vm5, %vm1786_vm7  ;;  %v1804_v50 = vand.u32 2147483647, %v4687_v18 }
 0x227   : > { %v3555_v63 = vmul.f32 -1.442695, %v1684_v28  ;;  %v3820_v32 = vpop.eup %3819  ;;  %3827 = vrcp.f32 %v4687_v18  ;;  %v1829_v30 = vadd.f32 %v3814_v24, %v1828_v12  ;;  %v1782_v62 = vsub.f32 1.0, %v1781_v53 }
 0x228   : > { %v4703_v52 = vadd.f32 1.0, %v3820_v32  ;;  %v3822_v45 = vpop.eup %3821  ;;  %vm4729_vm11 = vcmp.eq.f32.partialorder %v1879_v16, 8.507059e+37  ;;  %v1806_v32 = vand.u32 2147483648, %v4687_v18  ;;  %vm1800_vm12 = vweird.f32 %v4687_v18 }
 0x229   : > { %3829 = vpow2.f32 %v3555_v63  ;;  %v1833_v14 = vsel %vm1832_vm4, %v3814_v24, %v1829_v30  ;;  %v1783_v43 = vmul.f32 %v3818_v31, %v1782_v62  ;;  %v1871_v4 = vmul.f32 %v3822_v45, %v4667_v58 }
 0x22a   : > { %v1422_v21 = vpop.f32.mrf.mxu0  ;;  %v1464_v54 = vpop.f32.mrf.mxu1  ;;  %v1838_v48 = vsel %vm4697_vm2, %v1837_v42, %v1833_v14  ;;  %3831 = vrcp.f32 %v4703_v52  ;;  %v1881_v24 = vand.u32 2147483648, %v4667_v58  ;;  %vm1876_vm10 = vweird.f32 %v3822_v45 }
 0x22b   : > { %v3550_v22 = vmul.f32 -1.442695, %v1464_v54  ;;  %v3824_v47 = vpop.eup %3823  ;;  %v4718_v11 = vadd.f32 %v1838_v48, %v4479_v13  ;;  %v1784_v36 = vadd.f32 %v3818_v31, %v1783_v43  ;;  %v1872_v33 = vsub.f32 1.0, %v1871_v4  ;;  %vm1877_vm3 = vmor %vm1875_vm8, %vm1876_vm10 }
 0x22c   : > { %v4711_v49 = vpop.eup %3825  ;;  %v4724_v55 = vadd.f32 1.0, %v3824_v47  ;;  %v1882_v53 = vor.u32 1.1754944e-38, %v1881_v24  ;;  %vm4747_vm14 = vcmp.eq.f32.partialorder %v1804_v50, 8.507059e+37  ;;  %v1894_v58 = vand.u32 2147483647, %v4703_v52 }
 0x22d   : > { %v3828_v3 = vpop.eup %3827  ;;  %3833 = vpow2.f32 %v3550_v22  ;;  %v1788_v60 = vsel %vm1787_vm9, %v3818_v31, %v1784_v36  ;;  %v1873_v40 = vmul.f32 %v3822_v45, %v1872_v33  ;;  %v1807_v47 = vor.u32 1.1754944e-38, %v1806_v32 }
 0x22e   : > { %v1686_v51 = vpop.f32.mrf.mxu2  ;;  %v1728_v27 = vpop.f32.mrf.mxu3  ;;  %v1796_v13 = vmul.f32 %v3828_v3, %v4687_v18  ;;  %v1793_v44 = vsel %vm4706_vm6, %v1792_v5, %v1788_v60  ;;  %3835 = vrcp.f32 %v4724_v55  ;;  %vm1801_vm13 = vweird.f32 %v3828_v3 }
 0x22f   : > { %v3556_v34 = vmul.f32 -1.442695, %v1728_v27  ;;  %v3830_v2 = vpop.eup %3829  ;;  %v4736_v31 = vadd.f32 %v1793_v44, %v4503_v41  ;;  %v1874_v38 = vadd.f32 %v3822_v45, %v1873_v40  ;;  %vm1802_vm15 = vmor %vm1800_vm12, %vm1801_vm13  ;;  %vm1890_vm0 = vweird.f32 %v4703_v52 }
 0x230   : > { %v1797_v63 = vsub.f32 1.0, %v1796_v13  ;;  %v3832_v12 = vpop.eup %3831  ;;  %v4742_v19 = vadd.f32 1.0, %v3830_v2  ;;  %v1896_v4 = vand.u32 2147483648, %v4703_v52  ;;  %vm4765_vm4 = vcmp.eq.f32.partialorder %v1894_v58, 8.507059e+37 }
 0x231   : > { %3837 = vpow2.f32 %v3556_v34  ;;  %v1878_v23 = vsel %vm1877_vm3, %v3822_v45, %v1874_v38  ;;  %v1886_v41 = vmul.f32 %v3832_v12, %v4703_v52  ;;  %vm1891_vm2 = vweird.f32 %v3832_v12 }
 0x232   : > { %v1466_v37 = vpop.f32.mrf.mxu1  ;;  %v1596_v61 = vpop.f32.mrf.mxu0  ;;  %v1798_v21 = vmul.f32 %v3828_v3, %v1797_v63  ;;  %v1883_v30 = vsel %vm4729_vm11, %v1882_v53, %v1878_v23  ;;  %3839 = vrcp.f32 %v4742_v19  ;;  %v1849_v18 = vand.u32 2147483647, %v4724_v55  ;;  %vm1892_vm5 = vmor %vm1890_vm0, %vm1891_vm2 }
 0x233   : > { %v3834_v54 = vpop.eup %3833  ;;  %v4754_v45 = vadd.f32 %v1883_v30, %v4547_v10  ;;  %v1887_v14 = vsub.f32 1.0, %v1886_v41  ;;  %v3553_v5 = vmul.f32 -1.442695, %v1596_v61  ;;  %v1851_v13 = vand.u32 2147483648, %v4724_v55 }
 0x234   : > { %v1799_v22 = vadd.f32 %v3828_v3, %v1798_v21  ;;  %v3836_v43 = vpop.eup %3835  ;;  %v4760_v48 = vadd.f32 1.0, %v3834_v54  ;;  %v1897_v44 = vor.u32 1.1754944e-38, %v1896_v4  ;;  %vm1845_vm6 = vweird.f32 %v4724_v55 }
 0x235   : > { %v1888_v51 = vmul.f32 %v3832_v12, %v1887_v14  ;;  %v1841_v10 = vmul.f32 %v3836_v43, %v4724_v55  ;;  %vm1846_vm7 = vweird.f32 %v3836_v43  ;;  %vm4783_vm8 = vcmp.eq.f32.partialorder %v1849_v18, 8.507059e+37 }
 0x236   : > { %v1730_v62 = vpop.f32.mrf.mxu3  ;;  %v2082_v39 = vpop.f32.mrf.mxu2  ;;  %v1803_v16 = vsel %vm1802_vm15, %v3828_v3, %v1799_v22  ;;  %3841 = vrcp.f32 %v4760_v48  ;;  %v1939_v52 = vand.u32 2147483647, %v4742_v19  ;;  %vm1183_vm9 = vweird.f32 %v4569_v6  ;;  %vm1847_vm10 = vmor %vm1845_vm6, %vm1846_vm7 }
 0x237   : > { %v3838_v27 = vpop.eup %3837  ;;  %v1808_v36 = vsel %vm4747_vm14, %v1807_v47, %v1803_v16  ;;  %v1889_v60 = vadd.f32 %v3832_v12, %v1888_v51  ;;  %v1842_v40 = vsub.f32 1.0, %v1841_v10  ;;  %3843 = vpow2.f32 %v3553_v5 }
 0x238   : > { %v4772_v3 = vadd.f32 %v1808_v36, %v4561_v0  ;;  %v3840_v2 = vpop.eup %3839  ;;  %v4778_v28 = vadd.f32 1.0, %v3838_v27  ;;  %v1852_v23 = vor.u32 1.1754944e-38, %v1851_v13  ;;  %vm1935_vm11 = vweird.f32 %v4742_v19 }
 0x239   : > { %v1893_v50 = vsel %vm1892_vm5, %v3832_v12, %v1889_v60  ;;  %v1843_v37 = vmul.f32 %v3836_v43, %v1842_v40  ;;  %v1931_v0 = vmul.f32 %v3840_v2, %v4742_v19  ;;  %v1941_v54 = vand.u32 2147483648, %v4742_v19 }
 0x23a   : > { %v1598_v24 = vpop.f32.mrf.mxu0  ;;  %v1640_v34 = vpop.f32.mrf.mxu1  ;;  %v1898_v61 = vsel %vm4765_vm4, %v1897_v44, %v1893_v50  ;;  %3845 = vrcp.f32 %v4778_v28  ;;  %v1864_v30 = vand.u32 2147483647, %v4760_v48  ;;  %v3571_v42 = vmul.f32 -1.442695, %v2082_v39 }
 0x23b   : > { %v4791_v12 = vadd.f32 %v1898_v61, %v4584_v9  ;;  %v1844_v53 = vadd.f32 %v3836_v43, %v1843_v37  ;;  %v1932_v21 = vsub.f32 1.0, %v1931_v0  ;;  %vm1182_vm3 = vweird.f32 %v4489_v7 }
 0x23c   : > { %v3842_v41 = vpop.eup %3841  ;;  %vm1936_vm12 = vweird.f32 %v3840_v2  ;;  %vm4802_vm13 = vcmp.eq.f32.partialorder %v1939_v52, 8.507059e+37  ;;  %v1866_v14 = vand.u32 2147483648, %v4760_v48  ;;  %3847 = vpow2.f32 %v3571_v42 }
 0x23d   : > { %v1848_v58 = vsel %vm1847_vm10, %v3836_v43, %v1844_v53  ;;  %v1933_v62 = vmul.f32 %v3840_v2, %v1932_v21  ;;  %v1856_v9 = vmul.f32 %v3842_v41, %v4760_v48  ;;  %v3844_v22 = vpop.eup %3843  ;;  %vm1937_vm14 = vmor %vm1935_vm11, %vm1936_vm12  ;;  %v1942_v27 = vor.u32 1.1754944e-38, %v1941_v54 }
 0x23e   : > { %v2084_v63 = vpop.f32.mrf.mxu2  ;;  %v2120_v32 = vpop.f32.mrf.mxu3  ;;  %v1853_v47 = vsel %vm4783_vm8, %v1852_v23, %v1848_v58  ;;  %v4810_v51 = vadd.f32 1.0, %v3844_v22  ;;  %vm1860_vm15 = vweird.f32 %v4760_v48  ;;  %vm4815_vm0 = vcmp.eq.f32.partialorder %v1864_v30, 8.507059e+37  ;;  %vm4844_vm10 = vmor %vm1182_vm3, %vm1183_vm9 }
 0x23f   : > { %v4808_v5 = vadd.f32 %v1853_v47, %v4639_v1  ;;  %v1934_v43 = vadd.f32 %v3840_v2, %v1933_v62  ;;  %v1857_v16 = vsub.f32 1.0, %v1856_v9  ;;  %v3554_v33 = vmul.f32 -1.442695, %v1640_v34 }
 0x240   : > { %v3846_v10 = vpop.eup %3845  ;;  %vm4821_vm2 = vcmp.eq.f32.partialorder %v1186_v57, 8.507059e+37  ;;  %vm1861_vm4 = vweird.f32 %v3842_v41  ;;  %v1867_v40 = vor.u32 1.1754944e-38, %v1866_v14  ;;  %3849 = vrcp.f32 %v4810_v51 }
 0x241   : > { %v1938_v18 = vsel %vm1937_vm14, %v3840_v2, %v1934_v43  ;;  %v1858_v24 = vmul.f32 %v3842_v41, %v1857_v16  ;;  %v1946_v19 = vmul.f32 %v3846_v10, %v4778_v28  ;;  %v3572_v13 = vmul.f32 -1.442695, %v2120_v32  ;;  %vm1862_vm7 = vmor %vm1860_vm15, %vm1861_vm4 }
 0x242   : > { %v1642_v4 = vpop.f32.mrf.mxu1  ;;  %v2006_v39 = vpop.f32.mrf.mxu0  ;;  %v1943_v60 = vsel %vm4802_vm13, %v1942_v27, %v1938_v18  ;;  %vm1950_vm5 = vweird.f32 %v4778_v28  ;;  %vm1137_vm6 = vweird.f32 %v4557_v35  ;;  %v1954_v0 = vand.u32 2147483647, %v4778_v28 }
 0x243   : > { %v4830_v50 = vadd.f32 %v1943_v60, %v4672_v25  ;;  %v1859_v57 = vadd.f32 %v3842_v41, %v1858_v24  ;;  %v1947_v37 = vsub.f32 1.0, %v1946_v19  ;;  %v3848_v2 = vpop.eup %3847  ;;  %v1956_v61 = vand.u32 2147483648, %v4778_v28 }
 0x244   : > { %3851 = vpow2.f32 %v3554_v33  ;;  %v3569_v38 = vmul.f32 -1.442695, %v2006_v39  ;;  %vm1951_vm8 = vweird.f32 %v3846_v10  ;;  %v4838_v25 = vadd.f32 1.0, %v3848_v2 }
 0x245   : > { %v1863_v52 = vsel %vm1862_vm7, %v3842_v41, %v1859_v57  ;;  %v1948_v63 = vmul.f32 %v3846_v10, %v1947_v37  ;;  %v1135_v48 = vmul.f32 %v4625_v8, %v1134_v56  ;;  %3853 = vpow2.f32 %v3572_v13  ;;  %vm1952_vm11 = vmor %vm1950_vm5, %vm1951_vm8 }
 0x246   : > { %v2122_v44 = vpop.f32.mrf.mxu3  ;;  %v2234_v34 = vpop.f32.mrf.mxu2  ;;  %v1868_v53 = vsel %vm4815_vm0, %v1867_v40, %v1863_v52  ;;  %v1185_v7 = vsel %vm4844_vm10, %v4569_v6, %v4695_v29  ;;  %vm1138_vm9 = vweird.f32 %v4625_v8  ;;  %v1148_v56 = vmul.f32 %v4711_v49, %v4665_v20 }
 0x247   : > { %v3575_v23 = vmul.f32 -1.442695, %v2234_v34  ;;  %v4859_v54 = vadd.f32 %v1868_v53, %v4681_v15  ;;  %v1949_v59 = vadd.f32 %v3846_v10, %v1948_v63  ;;  %v3850_v30 = vpop.eup %3849  ;;  %v1957_v42 = vor.u32 1.1754944e-38, %v1956_v61  ;;  %vm4882_vm12 = vmor %vm1137_vm6, %vm1138_vm9 }
 0x248   : > { %3855 = vpow2.f32 %v3569_v38  ;;  %vm1955_vm3 = vcmp.eq.f32.partialorder %v1954_v0, 8.507059e+37  ;;  %v1901_v6 = vmul.f32 %v3850_v30, %v4810_v51  ;;  %v1190_v29 = vsel %vm4821_vm2, %v4652_v17, %v1185_v7 }
 0x249   : > { %v1953_v62 = vsel %vm1952_vm11, %v3846_v10, %v1949_v59  ;;  %3857 = vrcp.f32 %v4838_v25  ;;  %v1136_v9 = vadd.f32 %v4625_v8, %v1135_v48  ;;  %v1143_v16 = vand.u32 2147483648, %v4557_v35 }
 0x24a   : > { %v2008_v21 = vpop.f32.mrf.mxu0  ;;  %v2044_v41 = vpop.f32.mrf.mxu1  ;;  %v1958_v22 = vsel %vm1955_vm3, %v1957_v42, %v1953_v62  ;;  %3859 = vpow2.f32 %v3575_v23  ;;  %v1902_v14 = vsub.f32 1.0, %v1901_v6  ;;  %v1149_v10 = vsub.f32 1.0, %v1148_v56 }
 0x24b   : > { %v3570_v58 = vmul.f32 -1.442695, %v2044_v41  ;;  %v3852_v15 = vpop.eup %3851  ;;  %v4872_v55 = vadd.f32 %v1958_v22, %v1190_v29  ;;  %v1911_v27 = vand.u32 2147483648, %v4810_v51  ;;  %vm1906_vm13 = vweird.f32 %v3850_v30 }
 0x24c   : > { %v4874_v4 = vadd.f32 1.0, %v3852_v15  ;;  %v3854_v43 = vpop.eup %3853  ;;  %v1903_v36 = vmul.f32 %v3850_v30, %v1902_v14  ;;  %v1909_v33 = vand.u32 2147483647, %v4810_v51  ;;  %v1140_v18 = vsel %vm4882_vm12, %v4625_v8, %v1136_v9 }
 0x24d   : > { %3861 = vpow2.f32 %v3570_v58  ;;  %v4891_v24 = vadd.f32 1.0, %v3854_v43  ;;  %vm1905_vm14 = vweird.f32 %v4810_v51  ;;  %vm1142_vm15 = vcmp.eq.f32.partialorder %v1141_v26, 8.507059e+37 }
 0x24e   : > { %v2236_v28 = vpop.f32.mrf.mxu2  ;;  %v2272_v47 = vpop.f32.mrf.mxu3  ;;  %3863 = vrcp.f32 %v4874_v4  ;;  %v1904_v13 = vadd.f32 %v3850_v30, %v1903_v36  ;;  %v1144_v57 = vor.u32 1.1754944e-38, %v1143_v16  ;;  %vm1907_vm0 = vmor %vm1905_vm14, %vm1906_vm13  ;;  %v1912_v8 = vor.u32 1.1754944e-38, %v1911_v27 }
 0x24f   : > { %v3576_v39 = vmul.f32 -1.442695, %v2272_v47  ;;  %v3856_v1 = vpop.eup %3855  ;;  %v1150_v37 = vmul.f32 %v4711_v49, %v1149_v10  ;;  %vm1910_vm2 = vcmp.eq.f32.partialorder %v1909_v33, 8.507059e+37  ;;  %v1156_v63 = vand.u32 2147483647, %v4665_v20 }
 0x250   : > { %v4893_v40 = vpop.eup %3857  ;;  %v4896_v44 = vadd.f32 1.0, %v3856_v1  ;;  %v1908_v2 = vsel %vm1907_vm0, %v3850_v30, %v1904_v13  ;;  %v1145_v61 = vsel %vm1142_vm15, %v1144_v57, %v1140_v18  ;;  %v1158_v32 = vand.u32 2147483648, %v4665_v20 }
 0x251   : > { %3865 = vpow2.f32 %v3576_v39  ;;  %v3860_v34 = vpop.eup %3859  ;;  %v1913_v51 = vsel %vm1910_vm2, %v1912_v8, %v1908_v2  ;;  %v2507_v38 = vmul.f32 %v4893_v40, %v4838_v25  ;;  %vm1153_vm4 = vweird.f32 %v4711_v49 }
 0x252   : > { %v2046_v19 = vpop.f32.mrf.mxu1  ;;  %v2158_v60 = vpop.f32.mrf.mxu0  ;;  %3867 = vrcp.f32 %v4896_v44  ;;  %v4908_v48 = vadd.f32 %v1913_v51, %v1145_v61  ;;  %v1151_v21 = vadd.f32 %v4711_v49, %v1150_v37  ;;  %v1924_v41 = vand.u32 2147483647, %v4874_v4 }
 0x253   : > { %v3862_v0 = vpop.eup %3861  ;;  %3869 = vrcp.f32 %v4891_v24  ;;  %v1926_v7 = vand.u32 2147483648, %v4874_v4  ;;  %v4915_v59 = vadd.f32 1.0, %v3860_v34  ;;  %v2508_v30 = vsub.f32 1.0, %v2507_v38 }
 0x254   : > { %v3864_v52 = vpop.eup %3863  ;;  %v4917_v42 = vadd.f32 1.0, %v3862_v0  ;;  %vm1152_vm5 = vweird.f32 %v4665_v20  ;;  %vm4922_vm6 = vcmp.eq.f32.partialorder %v1156_v63, 8.507059e+37  ;;  %v1159_v29 = vor.u32 1.1754944e-38, %v1158_v32 }
 0x255   : > { %v1916_v53 = vmul.f32 %v3864_v52, %v4874_v4  ;;  %3871 = vrcp.f32 %v4915_v59  ;;  %vm4931_vm7 = vmor %vm1152_vm5, %vm1153_vm4  ;;  %vm1921_vm8 = vweird.f32 %v3864_v52  ;;  %vm1920_vm10 = vweird.f32 %v4874_v4 }
 0x256   : > { %v2274_v35 = vpop.f32.mrf.mxu3  ;;  %v2386_v26 = vpop.f32.mrf.mxu2  ;;  %v1155_v14 = vsel %vm4931_vm7, %v4711_v49, %v1151_v21  ;;  %vm4942_vm9 = vcmp.eq.f32.partialorder %v1924_v41, 8.507059e+37  ;;  %v1927_v43 = vor.u32 1.1754944e-38, %v1926_v7  ;;  %v2509_v16 = vmul.f32 %v4893_v40, %v2508_v30  ;;  %vm1922_vm11 = vmor %vm1920_vm10, %vm1921_vm8 }
 0x257   : > { %v3866_v23 = vpop.eup %3865  ;;  %v1917_v56 = vsub.f32 1.0, %v1916_v53  ;;  %3873 = vrcp.f32 %v4917_v42  ;;  %v2485_v49 = vand.u32 2147483647, %v4896_v44  ;;  %v2487_v4 = vand.u32 2147483648, %v4896_v44 }
 0x258   : > { %v3868_v6 = vpop.eup %3867  ;;  %v4936_v20 = vadd.f32 1.0, %v3866_v23  ;;  %v3573_v1 = vmul.f32 -1.442695, %v2158_v60  ;;  %v1160_v34 = vsel %vm4922_vm6, %v1159_v29, %v1155_v14  ;;  %v2517_v57 = vand.u32 2147483648, %v4838_v25 }
 0x259   : > { %v4927_v9 = vpop.eup %3869  ;;  %v1918_v28 = vmul.f32 %v3864_v52, %v1917_v56  ;;  %v2477_v47 = vmul.f32 %v3868_v6, %v4896_v44  ;;  %vm2482_vm3 = vweird.f32 %v3868_v6  ;;  %vm2481_vm12 = vweird.f32 %v4896_v44 }
 0x25a   : > { %v2160_v58 = vpop.f32.mrf.mxu0  ;;  %v4919_v62 = vpop.f32.mrf.mxu1  ;;  %v2522_v33 = vmul.f32 %v4927_v9, %v4891_v24  ;;  %3875 = vrcp.f32 %v4936_v20  ;;  %v4960_v37 = vadd.f32 %v4893_v40, %v2509_v16  ;;  %vm2483_vm13 = vmor %vm2481_vm12, %vm2482_vm3  ;;  %vm2486_vm14 = vcmp.eq.f32.partialorder %v2485_v49, 8.507059e+37 }
 0x25b   : > { %v1919_v10 = vadd.f32 %v3864_v52, %v1918_v28  ;;  %v2478_v27 = vsub.f32 1.0, %v2477_v47  ;;  %v3872_v13 = vpop.eup %3871  ;;  %v2488_v38 = vor.u32 1.1754944e-38, %v2487_v4  ;;  %v2577_v35 = vand.u32 2147483648, %v4915_v59 }
 0x25c   : > { %v2567_v0 = vmul.f32 %v3872_v13, %v4915_v59  ;;  %v2523_v32 = vsub.f32 1.0, %v2522_v33  ;;  %3877 = vpow2.f32 %v3573_v1  ;;  %vm2511_vm15 = vweird.f32 %v4838_v25 }
 0x25d   : > { %v1923_v18 = vsel %vm1922_vm11, %v3864_v52, %v1919_v10  ;;  %v2479_v19 = vmul.f32 %v3868_v6, %v2478_v27  ;;  %v3579_v52 = vmul.f32 -1.442695, %v2386_v26  ;;  %v3874_v63 = vpop.eup %3873  ;;  %vm2512_vm0 = vweird.f32 %v4893_v40 }
 0x25e   : > { %v2388_v17 = vpop.f32.mrf.mxu2  ;;  %v2424_v36 = vpop.f32.mrf.mxu3  ;;  %v1928_v8 = vsel %vm4942_vm9, %v1927_v43, %v1923_v18  ;;  %v2568_v44 = vsub.f32 1.0, %v2567_v0  ;;  %vm2571_vm2 = vweird.f32 %v4915_v59  ;;  %v2575_v21 = vand.u32 2147483647, %v4915_v59  ;;  %vm5008_vm12 = vmor %vm2511_vm15, %vm2512_vm0 }
 0x25f   : > { %v4962_v60 = vadd.f32 %v1928_v8, %v1160_v34  ;;  %v2480_v2 = vadd.f32 %v3868_v6, %v2479_v19  ;;  %v2492_v41 = vmul.f32 %v3874_v63, %v4917_v42  ;;  %vm2526_vm4 = vweird.f32 %v4891_v24 }
 0x260   : > { %v4971_v7 = vpop.eup %3875  ;;  %v2569_v30 = vmul.f32 %v3872_v13, %v2568_v44  ;;  %vm2572_vm5 = vweird.f32 %v3872_v13  ;;  %vm2496_vm6 = vweird.f32 %v4917_v42  ;;  %3879 = vpow2.f32 %v3579_v52 }
 0x261   : > { %v2484_v53 = vsel %vm2483_vm13, %v3868_v6, %v2480_v2  ;;  %v2578_v6 = vor.u32 1.1754944e-38, %v2577_v35  ;;  %v2493_v15 = vsub.f32 1.0, %v2492_v41  ;;  %v2582_v29 = vmul.f32 %v4971_v7, %v4936_v20  ;;  %vm2573_vm7 = vmor %vm2571_vm2, %vm2572_vm5 }
 0x262   : > { %v2198_v61 = vpop.f32.mrf.mxu1  ;;  %v2310_v51 = vpop.f32.mrf.mxu0  ;;  %v2489_v23 = vsel %vm2486_vm14, %v2488_v38, %v2484_v53  ;;  %v2570_v22 = vadd.f32 %v3872_v13, %v2569_v30  ;;  %v2502_v28 = vand.u32 2147483648, %v4917_v42  ;;  %v3574_v47 = vmul.f32 -1.442695, %v4919_v62 }
 0x263   : > { %v4975_v26 = vadd.f32 %v2489_v23, %v4736_v31  ;;  %v3580_v14 = vmul.f32 -1.442695, %v2424_v36  ;;  %v2494_v31 = vmul.f32 %v3874_v63, %v2493_v15  ;;  %vm2497_vm8 = vweird.f32 %v3874_v63  ;;  %v3878_v16 = vpop.eup %3877 }
 0x264   : > { %v2500_v39 = vand.u32 2147483647, %v4917_v42  ;;  %v2583_v43 = vsub.f32 1.0, %v2582_v29  ;;  %v2524_v10 = vmul.f32 %v4927_v9, %v2523_v32  ;;  %v2574_v27 = vsel %vm2573_vm7, %v3872_v13, %v2570_v22  ;;  %vm2498_vm11 = vmor %vm2496_vm6, %vm2497_vm8 }
 0x265   : > { %vm2576_vm10 = vcmp.eq.f32.partialorder %v2575_v21, 8.507059e+37  ;;  %3881 = vpow2.f32 %v3574_v47  ;;  %v2495_v4 = vadd.f32 %v3874_v63, %v2494_v31  ;;  %v4986_v62 = vadd.f32 1.0, %v3878_v16 }
 0x266   : > { %v2426_v56 = vpop.f32.mrf.mxu3  ;;  %v2778_v58 = vpop.f32.mrf.mxu2  ;;  %v2579_v49 = vsel %vm2576_vm10, %v2578_v6, %v2574_v27  ;;  %v3577_v36 = vmul.f32 -1.442695, %v2310_v51  ;;  %vm2527_vm9 = vweird.f32 %v4927_v9  ;;  %v2503_v1 = vor.u32 1.1754944e-38, %v2502_v28 }
 0x267   : > { %v4990_v59 = vadd.f32 %v2579_v49, %v4754_v45  ;;  %3883 = vpow2.f32 %v3580_v14  ;;  %v3880_v18 = vpop.eup %3879  ;;  %v2499_v19 = vsel %vm2498_vm11, %v3874_v63, %v2495_v4  ;;  %vm2501_vm3 = vcmp.eq.f32.partialorder %v2500_v39, 8.507059e+37  ;;  %vm5025_vm13 = vmor %vm2526_vm4, %vm2527_vm9 }
 0x268   : > { %v2584_v13 = vmul.f32 %v4971_v7, %v2583_v43  ;;  %3885 = vrcp.f32 %v4986_v62  ;;  %v2525_v34 = vadd.f32 %v4927_v9, %v2524_v10  ;;  %v2504_v8 = vsel %vm2501_vm3, %v2503_v1, %v2499_v19 }
 0x269   : > { %v4998_v2 = vadd.f32 1.0, %v3880_v18  ;;  %v3595_v45 = vmul.f32 -1.442695, %v2778_v58  ;;  %v2532_v42 = vand.u32 2147483648, %v4891_v24  ;;  %v5002_v51 = vadd.f32 %v2504_v8, %v4772_v3 }
 0x26a   : > { %v2312_v17 = vpop.f32.mrf.mxu0  ;;  %v2348_v33 = vpop.f32.mrf.mxu1  ;;  %3887 = vpow2.f32 %v3577_v36  ;;  %v2515_v63 = vand.u32 2147483647, %v4838_v25  ;;  %v2518_v32 = vor.u32 1.1754944e-38, %v2517_v57  ;;  %v2530_v53 = vand.u32 2147483647, %v4891_v24 }
 0x26b   : > { %v3578_v38 = vmul.f32 -1.442695, %v2348_v33  ;;  %v3882_v35 = vpop.eup %3881  ;;  %3889 = vrcp.f32 %v4998_v2  ;;  %v2514_v3 = vsel %vm5008_vm12, %v4893_v40, %v4960_v37  ;;  %v2585_v25 = vadd.f32 %v4971_v7, %v2584_v13 }
 0x26c   : > { %vm2586_vm14 = vweird.f32 %v4936_v20  ;;  %vm2587_vm15 = vweird.f32 %v4971_v7  ;;  %v2529_v23 = vsel %vm5025_vm13, %v4927_v9, %v2525_v34  ;;  %v2592_v40 = vand.u32 2147483648, %v4936_v20 }
 0x26d   : > { %v3884_v57 = vpop.eup %3883  ;;  %v5036_v37 = vadd.f32 1.0, %v3882_v35  ;;  %3891 = vpow2.f32 %v3595_v45  ;;  %v2533_v30 = vor.u32 1.1754944e-38, %v2532_v42  ;;  %v2590_v56 = vand.u32 2147483647, %v4936_v20  ;;  %vm5049_vm4 = vmor %vm2586_vm14, %vm2587_vm15 }
 0x26e   : > { %v2780_v0 = vpop.f32.mrf.mxu2  ;;  %v2816_v61 = vpop.f32.mrf.mxu3  ;;  %v5043_v58 = vadd.f32 1.0, %v3884_v57  ;;  %3893 = vpow2.f32 %v3578_v38  ;;  %vm2516_vm0 = vcmp.eq.f32.partialorder %v2515_v63, 8.507059e+37  ;;  %vm2531_vm2 = vcmp.eq.f32.partialorder %v2530_v53, 8.507059e+37 }
 0x26f   : > { %v5040_v41 = vpop.eup %3885  ;;  %3895 = vrcp.f32 %v5036_v37  ;;  %v2519_v29 = vsel %vm2516_vm0, %v2518_v32, %v2514_v3  ;;  %v2534_v22 = vsel %vm2531_vm2, %v2533_v30, %v2529_v23  ;;  %v2589_v28 = vsel %vm5049_vm4, %v4971_v7, %v2585_v25 }
 0x270   : > { %v2537_v6 = vmul.f32 %v5040_v41, %v4986_v62  ;;  %v3888_v15 = vpop.eup %3887  ;;  %3897 = vrcp.f32 %v5043_v58  ;;  %v2593_v20 = vor.u32 1.1754944e-38, %v2592_v40  ;;  %v2547_v14 = vand.u32 2147483648, %v4986_v62 }
 0x271   : > { %v5060_v47 = vpop.eup %3889  ;;  %v5063_v31 = vadd.f32 1.0, %v3888_v15  ;;  %v3596_v39 = vmul.f32 -1.442695, %v2816_v61  ;;  %vm2591_vm5 = vcmp.eq.f32.partialorder %v2590_v56, 8.507059e+37  ;;  %v2637_v33 = vand.u32 2147483648, %v4998_v2 }
 0x272   : > { %v2350_v24 = vpop.f32.mrf.mxu1  ;;  %v5038_v21 = vpop.f32.mrf.mxu0  ;;  %v2594_v27 = vsel %vm2591_vm5, %v2593_v20, %v2589_v28  ;;  %v2538_v17 = vsub.f32 1.0, %v2537_v6  ;;  %v5070_v49 = vadd.f32 %v2519_v29, %v4676_v46  ;;  %v5073_v4 = vadd.f32 %v2534_v22, %v4718_v11 }
 0x273   : > { %v3892_v10 = vpop.eup %3891  ;;  %3899 = vrcp.f32 %v5063_v31  ;;  %vm2541_vm6 = vweird.f32 %v4986_v62  ;;  %v2627_v36 = vmul.f32 %v5060_v47, %v4998_v2  ;;  %v2545_v18 = vand.u32 2147483647, %v4986_v62 }
 0x274   : > { %v3894_v7 = vpop.eup %3893  ;;  %v5081_v19 = vor.u32 1.1754944e-38, %v2547_v14  ;;  %v5083_v13 = vadd.f32 1.0, %v3892_v10  ;;  %3901 = vpow2.f32 %v3596_v39  ;;  %v5088_v11 = vadd.f32 %v2594_v27, %v4791_v12 }
 0x275   : > { %v5078_v1 = vpop.eup %3895  ;;  %v2635_v45 = vand.u32 2147483647, %v4998_v2  ;;  %v2650_v0 = vand.u32 2147483647, %v5043_v58  ;;  %v2652_v61 = vand.u32 2147483648, %v5043_v58  ;;  %v2539_v42 = vmul.f32 %v5040_v41, %v2538_v17 }
 0x276   : > { %v2818_v43 = vpop.f32.mrf.mxu3  ;;  %v5065_v16 = vpop.f32.mrf.mxu2  ;;  %vm2542_vm7 = vweird.f32 %v5040_v41  ;;  %v5095_v38 = vor.u32 1.1754944e-38, %v2637_v33  ;;  %v2628_v52 = vsub.f32 1.0, %v2627_v36  ;;  %v2560_v63 = vand.u32 2147483647, %v5036_v37 }
 0x277   : > { %v3898_v8 = vpop.eup %3897  ;;  %3903 = vrcp.f32 %v5083_v13  ;;  %v5100_v12 = vadd.f32 1.0, %v3894_v7  ;;  %v2552_v53 = vmul.f32 %v5078_v1, %v5036_v37  ;;  %v2562_v3 = vand.u32 2147483648, %v5036_v37  ;;  %vm5125_vm3 = vmor %vm2541_vm6, %vm2542_vm7 }
 0x278   : > { %v2642_v35 = vmul.f32 %v3898_v8, %v5043_v58  ;;  %v2605_v25 = vand.u32 2147483647, %v5063_v31  ;;  %vm2646_vm8 = vweird.f32 %v5043_v58  ;;  %vm5109_vm10 = vcmp.eq.f32.partialorder %v2650_v0, 8.507059e+37 }
 0x279   : > { %v3900_v32 = vpop.eup %3899  ;;  %v2653_v24 = vor.u32 1.1754944e-38, %v2652_v61  ;;  %v5115_v9 = vadd.f32 %v5040_v41, %v2539_v42  ;;  %vm2647_vm9 = vweird.f32 %v3898_v8  ;;  %v2607_v15 = vand.u32 2147483648, %v5063_v31 }
 0x27a   : > { %v2704_v34 = vpop.f32.mrf.mxu0  ;;  %v5085_v46 = vpop.f32.mrf.mxu1  ;;  %v2643_v44 = vsub.f32 1.0, %v2642_v35  ;;  %v2597_v30 = vmul.f32 %v3900_v32, %v5063_v31  ;;  %v2629_v29 = vmul.f32 %v5060_v47, %v2628_v52  ;;  %vm2601_vm11 = vweird.f32 %v5063_v31  ;;  %vm2648_vm13 = vmor %vm2646_vm8, %vm2647_vm9 }
 0x27b   : > { %v3902_v56 = vpop.eup %3901  ;;  %3905 = vrcp.f32 %v5100_v12  ;;  %v2553_v20 = vsub.f32 1.0, %v2552_v53  ;;  %vm5129_vm12 = vcmp.eq.f32.partialorder %v2605_v25, 8.507059e+37  ;;  %v3211_v43 = vand.u32 2147483647, %v5083_v13 }
 0x27c   : > { %v2644_v6 = vmul.f32 %v3898_v8, %v2643_v44  ;;  %v2598_v22 = vsub.f32 1.0, %v2597_v30  ;;  %vm2602_vm14 = vweird.f32 %v3900_v32  ;;  %v3213_v7 = vand.u32 2147483648, %v5083_v13 }
 0x27d   : > { %v3904_v17 = vpop.eup %3903  ;;  %v5137_v36 = vadd.f32 1.0, %v3902_v56  ;;  %v2544_v34 = vsel %vm5125_vm3, %v5040_v41, %v5115_v9  ;;  %v2608_v61 = vor.u32 1.1754944e-38, %v2607_v15  ;;  %v5145_v35 = vadd.f32 %v5060_v47, %v2629_v29  ;;  %vm2603_vm4 = vmor %vm2601_vm11, %vm2602_vm14 }
 0x27e   : > { %v2932_v57 = vpop.f32.mrf.mxu2  ;;  %v5106_v23 = vpop.f32.mrf.mxu3  ;;  %v2645_v14 = vadd.f32 %v3898_v8, %v2644_v6  ;;  %v2599_v33 = vmul.f32 %v3900_v32, %v2598_v22  ;;  %v3203_v42 = vmul.f32 %v3904_v17, %v5083_v13  ;;  %vm3207_vm15 = vweird.f32 %v5083_v13 }
 0x27f   : > { %vm2631_vm0 = vweird.f32 %v4998_v2  ;;  %vm2632_vm2 = vweird.f32 %v5060_v47  ;;  %v5153_v53 = vmul.f32 %v5078_v1, %v2553_v20  ;;  %3907 = vrcp.f32 %v5137_v36 }
 0x280   : > { %v2649_v0 = vsel %vm2648_vm13, %v3898_v8, %v2645_v14  ;;  %v2600_v52 = vadd.f32 %v3900_v32, %v2599_v33  ;;  %v3204_v44 = vsub.f32 1.0, %v3203_v42  ;;  %vm5162_vm5 = vcmp.eq.f32.partialorder %v3211_v43, 8.507059e+37 }
 0x281   : > { %v2654_v58 = vsel %vm5109_vm10, %v2653_v24, %v2649_v0  ;;  %v3906_v40 = vpop.eup %3905  ;;  %v3214_v56 = vor.u32 1.1754944e-38, %v3213_v7  ;;  %v2620_v6 = vand.u32 2147483647, %v5100_v12  ;;  %vm3208_vm6 = vweird.f32 %v3904_v17 }
 0x282   : > { %v2742_v10 = vpop.f32.mrf.mxu1  ;;  %v2854_v27 = vpop.f32.mrf.mxu0  ;;  %v5156_v8 = vadd.f32 %v2654_v58, %v4872_v55  ;;  %v2604_v24 = vsel %vm2603_vm4, %v3900_v32, %v2600_v52  ;;  %v3205_v31 = vmul.f32 %v3904_v17, %v3204_v44  ;;  %v2612_v15 = vmul.f32 %v3906_v40, %v5100_v12  ;;  %vm3209_vm10 = vmor %vm3207_vm15, %vm3208_vm6 }
 0x283   : > { %v2609_v55 = vsel %vm5129_vm12, %v2608_v61, %v2604_v24  ;;  %vm2616_vm7 = vweird.f32 %v5100_v12  ;;  %v2622_v32 = vand.u32 2147483648, %v5100_v12  ;;  %v3593_v22 = vmul.f32 -1.442695, %v5038_v21  ;;  %vm5218_vm4 = vmor %vm2631_vm0, %vm2632_vm2 }
 0x284   : > { %v5171_v29 = vadd.f32 %v2609_v55, %v4908_v48  ;;  %vm5178_vm8 = vcmp.eq.f32.partialorder %v2545_v18, 8.507059e+37  ;;  %v3206_v14 = vadd.f32 %v3904_v17, %v3205_v31  ;;  %v2613_v39 = vsub.f32 1.0, %v2612_v15 }
 0x285   : > { %v3599_v43 = vmul.f32 -1.442695, %v5065_v16  ;;  %v3594_v10 = vmul.f32 -1.442695, %v5085_v46  ;;  %vm2617_vm9 = vweird.f32 %v3906_v40  ;;  %vm5187_vm11 = vcmp.eq.f32.partialorder %v2620_v6, 8.507059e+37  ;;  %v3908_v18 = vpop.eup %3907 }
 0x286   : > { %v2970_v25 = vpop.f32.mrf.mxu3  ;;  %v3082_v57 = vpop.f32.mrf.mxu2  ;;  %3909 = vpow2.f32 %v3593_v22  ;;  %v3600_v62 = vmul.f32 -1.442695, %v5106_v23  ;;  %vm5194_vm12 = vcmp.eq.f32.partialorder %v2635_v45, 8.507059e+37  ;;  %v3210_v46 = vsel %vm3209_vm10, %v3904_v17, %v3206_v14  ;;  %vm2618_vm14 = vmor %vm2616_vm7, %vm2617_vm9 }
 0x287   : > { %v2614_v7 = vmul.f32 %v3906_v40, %v2613_v39  ;;  %3911 = vpow2.f32 %v3599_v43  ;;  %v3597_v13 = vmul.f32 -1.442695, %v2854_v27  ;;  %v3215_v0 = vsel %vm5162_vm5, %v3214_v56, %v3210_v46 }
 0x288   : > { %v3218_v61 = vmul.f32 %v3908_v18, %v5137_v36  ;;  %3913 = vpow2.f32 %v3594_v10  ;;  %v3603_v42 = vmul.f32 -1.442695, %v3082_v57  ;;  %vm2556_vm13 = vweird.f32 %v5036_v37 }
 0x289   : > { %v3354_v23 = vadd.f32 %v3215_v0, %v5070_v49  ;;  %v2615_v58 = vadd.f32 %v3906_v40, %v2614_v7  ;;  %v2623_v45 = vor.u32 1.1754944e-38, %v2622_v32  ;;  %3915 = vpow2.f32 %v3600_v62 }
 0x28a   : > { %v2856_v48 = vpop.f32.mrf.mxu0  ;;  %v2892_v33 = vpop.f32.mrf.mxu1  ;;  %v3219_v27 = vsub.f32 1.0, %v3218_v61  ;;  %vm3222_vm15 = vweird.f32 %v5137_v36  ;;  %v3226_v49 = vand.u32 2147483647, %v5137_v36  ;;  %v3228_v24 = vand.u32 2147483648, %v5137_v36 }
 0x28b   : > { %v3598_v17 = vmul.f32 -1.442695, %v2892_v33  ;;  %v3366_v25 = vmul.f32 0.25, %v3354_v23  ;;  %v2619_v57 = vsel %vm2618_vm14, %v3906_v40, %v2615_v58  ;;  %3917 = vpow2.f32 %v3597_v13 }
 0x28c   : > { %v3910_v30 = vpop.eup %3909  ;;  %v2624_v56 = vsel %vm5187_vm11, %v2623_v45, %v2619_v57  ;;  %v3220_v6 = vmul.f32 %v3908_v18, %v3219_v27  ;;  %vm3223_vm5 = vweird.f32 %v3908_v18  ;;  %3919 = vpow2.f32 %v3603_v42 }
 0x28d   : > { %v3912_v55 = vpop.eup %3911  ;;  %v2634_v40 = vsel %vm5218_vm4, %v5060_v47, %v5145_v35  ;;  %vm2557_vm6 = vweird.f32 %v5078_v1  ;;  %3378 = vst.msk [vmem:[%s5206_s22 + $0x10] sm:$0xff] %vm309_vm1, %v3366_v25  ;;  %v5232_v2 = vadd.f32 %v2624_v56, %v4962_v60  ;;  %v5234_v31 = vadd.f32 1.0, %v3910_v30  ;;  %vm3224_vm0 = vmor %vm3222_vm15, %vm3223_vm5 }
 0x28e   : > { %v3120_v52 = vpop.f32.mrf.mxu3  ;;  %v3084_v44 = vpop.f32.mrf.mxu2  ;;  %v2549_v47 = vsel %vm5178_vm8, %v5081_v19, %v2544_v34  ;;  %v3221_v35 = vadd.f32 %v3908_v18, %v3220_v6  ;;  %v5244_v14 = vadd.f32 1.0, %v3912_v55  ;;  %3921 = vpow2.f32 %v3598_v17  ;;  %vm5270_vm2 = vmor %vm2556_vm13, %vm2557_vm6 }
 0x28f   : > { %v3914_v22 = vpop.eup %3913  ;;  %v5248_v39 = vadd.f32 %v5078_v1, %v5153_v53  ;;  %v3229_v28 = vor.u32 1.1754944e-38, %v3228_v24  ;;  %3923 = vrcp.f32 %v5234_v31  ;;  %v3604_v41 = vmul.f32 -1.442695, %v3120_v52 }
 0x290   : > { %v3916_v60 = vpop.eup %3915  ;;  %v2639_v19 = vsel %vm5194_vm12, %v5095_v38, %v2634_v40  ;;  %v3225_v9 = vsel %vm3224_vm0, %v3908_v18, %v3221_v35  ;;  %vm3227_vm3 = vcmp.eq.f32.partialorder %v3226_v49, 8.507059e+37  ;;  %3925 = vrcp.f32 %v5244_v14 }
 0x291   : > { %v3918_v34 = vpop.eup %3917  ;;  %v5259_v53 = vadd.f32 %v2549_v47, %v4808_v5  ;;  %v5263_v36 = vor.u32 1.1754944e-38, %v2562_v3  ;;  %v3230_v20 = vsel %vm3227_vm3, %v3229_v28, %v3225_v9  ;;  %v3181_v43 = vand.u32 2147483647, %v5234_v31 }
 0x292   : > { %v2894_v15 = vpop.f32.mrf.mxu1  ;;  %v3006_v32 = vpop.f32.mrf.mxu0  ;;  %v3355_v5 = vadd.f32 %v3230_v20, %v5073_v4  ;;  %v3183_v33 = vand.u32 2147483648, %v5234_v31  ;;  %v5276_v21 = vadd.f32 1.0, %v3914_v22  ;;  %v5278_v3 = vadd.f32 1.0, %v3916_v60 }
 0x293   : > { %v3920_v48 = vpop.eup %3919  ;;  %v5281_v62 = vadd.f32 %v2639_v19, %v4830_v50  ;;  %v2559_v18 = vsel %vm5270_vm2, %v5078_v1, %v5248_v39  ;;  %v3271_v16 = vand.u32 2147483647, %v5244_v14  ;;  %3927 = vpow2.f32 %v3604_v41 }
 0x294   : > { %v3922_v46 = vpop.eup %3921  ;;  %v3367_v4 = vmul.f32 0.25, %v3355_v5  ;;  %v3273_v7 = vand.u32 2147483648, %v5244_v14  ;;  %3929 = vrcp.f32 %v5276_v21  ;;  %v5290_v13 = vadd.f32 1.0, %v3918_v34 }
 0x295   : > { %v3924_v0 = vpop.eup %3923  ;;  %vm3177_vm7 = vweird.f32 %v5234_v31  ;;  %3931 = vrcp.f32 %v5278_v3  ;;  %v5294_v50 = vadd.f32 1.0, %v3920_v48  ;;  %v5296_v61 = vmul.f32 -1.442695, %v3006_v32 }
 0x296   : > { %v3122_v10 = vpop.f32.mrf.mxu3  ;;  %v3926_v58 = vpop.eup %3925  ;;  %3379 = vst.msk [vmem:[%s5206_s22 + $0x18] sm:$0xff] %vm309_vm1, %v3367_v4  ;;  %v3173_v45 = vmul.f32 %v3924_v0, %v5234_v31  ;;  %vm5303_vm8 = vcmp.eq.f32.partialorder %v3181_v43, 8.507059e+37  ;;  %v3184_v44 = vor.u32 1.1754944e-38, %v3183_v33  ;;  %vm3267_vm10 = vweird.f32 %v5244_v14 }
 0x297   : > { %v3263_v27 = vmul.f32 %v3926_v58, %v5244_v14  ;;  %vm5309_vm9 = vcmp.eq.f32.partialorder %v3271_v16, 8.507059e+37  ;;  %v3196_v17 = vand.u32 2147483647, %v5276_v21  ;;  %v3198_v25 = vand.u32 2147483648, %v5276_v21 }
 0x298   : > { %v3288_v57 = vand.u32 2147483648, %v5278_v3  ;;  %v3174_v24 = vsub.f32 1.0, %v3173_v45  ;;  %v3274_v30 = vor.u32 1.1754944e-38, %v3273_v7  ;;  %v3286_v12 = vand.u32 2147483647, %v5278_v3 }
 0x299   : > { %3933 = vrcp.f32 %v5290_v13  ;;  %v5318_v56 = vpop.eup %3927  ;;  %v3264_v6 = vsub.f32 1.0, %v3263_v27  ;;  %vm3192_vm11 = vweird.f32 %v5276_v21  ;;  %v5322_v55 = vadd.f32 1.0, %v3922_v46 }
 0x29a   : > { %v3008_v42 = vpop.f32.mrf.mxu0  ;;  %v5298_v23 = vpop.f32.mrf.mxu1  ;;  %3935 = vrcp.f32 %v5294_v50  ;;  %v3175_v15 = vmul.f32 %v3924_v0, %v3174_v24  ;;  %vm3178_vm12 = vweird.f32 %v3924_v0  ;;  %vm3268_vm13 = vweird.f32 %v3926_v58 }
 0x29b   : > { %v3930_v40 = vpop.eup %3929  ;;  %vm3282_vm14 = vweird.f32 %v5278_v3  ;;  %v3265_v22 = vmul.f32 %v3926_v58, %v3264_v6  ;;  %vm5326_vm15 = vcmp.eq.f32.partialorder %v3196_v17, 8.507059e+37  ;;  %v3199_v60 = vor.u32 1.1754944e-38, %v3198_v25  ;;  %vm5339_vm5 = vmor %vm3177_vm7, %vm3178_vm12 }
 0x29c   : > { %v3932_v32 = vpop.eup %3931  ;;  %v3188_v47 = vmul.f32 %v3930_v40, %v5276_v21  ;;  %v3289_v28 = vor.u32 1.1754944e-38, %v3288_v57  ;;  %v3176_v41 = vadd.f32 %v3924_v0, %v3175_v15  ;;  %vm5331_vm4 = vcmp.eq.f32.partialorder %v3286_v12, 8.507059e+37  ;;  %vm3269_vm3 = vmor %vm3267_vm10, %vm3268_vm13 }
 0x29d   : > { %v3278_v19 = vmul.f32 %v3932_v32, %v5278_v3  ;;  %v3241_v34 = vand.u32 2147483647, %v5290_v13  ;;  %v3243_v20 = vand.u32 2147483648, %v5290_v13  ;;  %v3266_v10 = vadd.f32 %v3926_v58, %v3265_v22 }
 0x29e   : > { %v3189_v48 = vsub.f32 1.0, %v3188_v47  ;;  %vm3237_vm6 = vweird.f32 %v5290_v13  ;;  %vm3327_vm0 = vweird.f32 %v5294_v50  ;;  %v3331_v5 = vand.u32 2147483647, %v5294_v50 }
 0x29f   : > { %v3333_v33 = vand.u32 2147483648, %v5294_v50  ;;  %v3934_v46 = vpop.eup %3933  ;;  %v3180_v4 = vsel %vm5339_vm5, %v3924_v0, %v3176_v41  ;;  %vm3193_vm7 = vweird.f32 %v3930_v40  ;;  %v3279_v31 = vsub.f32 1.0, %v3278_v19 }
 0x2a0   : > { %3937 = vrcp.f32 %v5322_v55  ;;  %v3936_v7 = vpop.eup %3935  ;;  %v3185_v42 = vsel %vm5303_vm8, %v3184_v44, %v3180_v4  ;;  %v3270_v45 = vsel %vm3269_vm3, %v3926_v58, %v3266_v10  ;;  %v3190_v27 = vmul.f32 %v3930_v40, %v3189_v48  ;;  %vm3194_vm10 = vmor %vm3192_vm11, %vm3193_vm7 }
 0x2a1   : > { %v3233_v17 = vmul.f32 %v3934_v46, %v5290_v13  ;;  %v3352_v25 = vadd.f32 %v3185_v42, %v4975_v26  ;;  %v3275_v0 = vsel %vm5309_vm9, %v3274_v30, %v3270_v45  ;;  %v3280_v57 = vmul.f32 %v3932_v32, %v3279_v31 }
 0x2a2   : > { %v3046_v16 = vpop.f32.mrf.mxu1  ;;  %vm3283_vm12 = vweird.f32 %v3932_v32  ;;  %v3358_v14 = vadd.f32 %v3275_v0, %v4990_v59  ;;  %v3191_v24 = vadd.f32 %v3930_v40, %v3190_v27  ;;  %v3323_v6 = vmul.f32 %v3936_v7, %v5294_v50 }
 0x2a3   : > { %v3234_v12 = vsub.f32 1.0, %v3233_v17  ;;  %vm5363_vm8 = vcmp.eq.f32.partialorder %v2560_v63, 8.507059e+37  ;;  %v3364_v52 = vmul.f32 0.25, %v3352_v25  ;;  %v3281_v26 = vadd.f32 %v3932_v32, %v3280_v57  ;;  %vm3284_vm5 = vmor %vm3282_vm14, %vm3283_vm12 }
 0x2a4   : > { %vm3238_vm9 = vweird.f32 %v3934_v46  ;;  %vm5370_vm13 = vcmp.eq.f32.partialorder %v3241_v34, 8.507059e+37  ;;  %v3370_v44 = vmul.f32 0.25, %v3358_v14  ;;  %v3195_v49 = vsel %vm3194_vm10, %v3930_v40, %v3191_v24 }
 0x2a5   : > { %v3235_v37 = vmul.f32 %v3934_v46, %v3234_v12  ;;  %v3324_v63 = vsub.f32 1.0, %v3323_v6  ;;  %3376 = vst.msk [vmem:[%s5206_s22] sm:$0xff] %vm309_vm1, %v3364_v52  ;;  %v3200_v21 = vsel %vm5326_vm15, %v3199_v60, %v3195_v49  ;;  %v3285_v15 = vsel %vm3284_vm5, %v3932_v32, %v3281_v26  ;;  %vm3239_vm14 = vmor %vm3237_vm6, %vm3238_vm9 }
 0x2a6   : > { %v3938_v30 = vpop.eup %3937  ;;  %v3244_v22 = vor.u32 1.1754944e-38, %v3243_v20  ;;  %vm3328_vm11 = vweird.f32 %v3936_v7  ;;  %3382 = vst.msk [vmem:[%s5206_s22 + $0x30] sm:$0xff] %vm309_vm1, %v3370_v44  ;;  %v3353_v47 = vadd.f32 %v3200_v21, %v5002_v51  ;;  %v3290_v40 = vsel %vm5331_vm4, %v3289_v28, %v3285_v15 }
 0x2a7   : > { %v3236_v3 = vadd.f32 %v3934_v46, %v3235_v37  ;;  %v3325_v41 = vmul.f32 %v3936_v7, %v3324_v63  ;;  %v3359_v19 = vadd.f32 %v3290_v40, %v5088_v11  ;;  %vm5389_vm15 = vcmp.eq.f32.partialorder %v3331_v5, 8.507059e+37  ;;  %vm3329_vm4 = vmor %vm3327_vm0, %vm3328_vm11 }
 0x2a8   : > { %v3334_v35 = vor.u32 1.1754944e-38, %v3333_v33  ;;  %v3248_v51 = vmul.f32 %v3938_v30, %v5322_v55  ;;  %v3365_v60 = vmul.f32 0.25, %v3353_v47  ;;  %v3171_v34 = vadd.f32 1.0, %v5318_v56 }
 0x2a9   : > { %v3240_v9 = vsel %vm3239_vm14, %v3934_v46, %v3236_v3  ;;  %v3326_v28 = vadd.f32 %v3936_v7, %v3325_v41  ;;  %v3371_v20 = vmul.f32 0.25, %v3359_v19  ;;  %3939 = vpow2.f32 %v5296_v61 }
 0x2aa   : > { %v3245_v11 = vsel %vm5370_vm13, %v3244_v22, %v3240_v9  ;;  %v3249_v13 = vsub.f32 1.0, %v3248_v51  ;;  %3377 = vst.msk [vmem:[%s5206_s22 + $0x8] sm:$0xff] %vm309_vm1, %v3365_v60  ;;  %v3258_v48 = vand.u32 2147483648, %v5322_v55  ;;  %3941 = vrcp.f32 %v3171_v34 }
 0x2ab   : > { %v3356_v43 = vadd.f32 %v3245_v11, %v5259_v53  ;;  %v3330_v10 = vsel %vm3329_vm4, %v3936_v7, %v3326_v28  ;;  %3383 = vst.msk [vmem:[%s5206_s22 + $0x38] sm:$0xff] %vm309_vm1, %v3371_v20  ;;  %vm3253_vm6 = vweird.f32 %v3938_v30  ;;  %v3256_v50 = vand.u32 2147483647, %v5322_v55 }
 0x2ac   : > { %v3335_v56 = vsel %vm5389_vm15, %v3334_v35, %v3330_v10  ;;  %v3250_v5 = vmul.f32 %v3938_v30, %v3249_v13  ;;  %v2564_v53 = vsel %vm5363_vm8, %v5263_v36, %v2559_v18  ;;  %v3602_v16 = vmul.f32 -1.442695, %v5298_v23 }
 0x2ad   : > { %v3368_v61 = vmul.f32 0.25, %v3356_v43  ;;  %v3362_v33 = vadd.f32 %v3335_v56, %v5281_v62  ;;  %vm3252_vm0 = vweird.f32 %v5322_v55  ;;  %v3259_v38 = vor.u32 1.1754944e-38, %v3258_v48 }
 0x2ae   : > { %v3251_v46 = vadd.f32 %v3938_v30, %v3250_v5  ;;  %vm3254_vm3 = vmor %vm3252_vm0, %vm3253_vm6  ;;  %3943 = vpow2.f32 %v3602_v16  ;;  %v2661_v39 = vadd.f32 %v2564_v53, %v4859_v54  ;;  %vm3257_vm2 = vcmp.eq.f32.partialorder %v3256_v50, 8.507059e+37 }
 0x2af   : > { %3380 = vst.msk [vmem:[%s5206_s22 + $0x20] sm:$0xff] %vm309_vm1, %v3368_v61  ;;  %v3374_v4 = vmul.f32 0.25, %v3362_v33  ;;  %v3940_v1 = vpop.eup %3939  ;;  %vm3342_vm7 = vweird.f32 %v3171_v34  ;;  %v3348_v27 = vand.u32 2147483648, %v3171_v34  ;;  %v3346_v54 = vand.u32 2147483647, %v3171_v34 }
 0x2b0   : > { %v3255_v36 = vsel %vm3254_vm3, %v3938_v30, %v3251_v46  ;;  %v3942_v18 = vpop.eup %3941  ;;  %v3168_v23 = vadd.f32 1.0, %v3940_v1 }
 0x2b1   : > { %3386 = vst.msk [vmem:[%s5206_s22 + $0x50] sm:$0xff] %vm309_vm1, %v3374_v4  ;;  %v3260_v62 = vsel %vm3257_vm2, %v3259_v38, %v3255_v36  ;;  %v3338_v7 = vmul.f32 %v3942_v18, %v3171_v34  ;;  %vm3343_vm12 = vweird.f32 %v3942_v18  ;;  %v3349_v14 = vor.u32 1.1754944e-38, %v3348_v27 }
 0x2b2   : > { %v3357_v31 = vadd.f32 %v3260_v62, %v2661_v39  ;;  %3945 = vrcp.f32 %v3168_v23  ;;  %vm3344_vm8 = vmor %vm3342_vm7, %vm3343_vm12  ;;  %vm3347_vm10 = vcmp.eq.f32.partialorder %v3346_v54, 8.507059e+37  ;;  %v3303_v26 = vand.u32 2147483648, %v3168_v23 }
 0x2b3   : > { %v3339_v42 = vsub.f32 1.0, %v3338_v7  ;;  %v3301_v37 = vand.u32 2147483647, %v3168_v23  ;;  %vm3297_vm13 = vweird.f32 %v3168_v23 }
 0x2b4   : > { %v3369_v55 = vmul.f32 0.25, %v3357_v31  ;;  %v3944_v45 = vpop.eup %3943  ;;  %v3304_v21 = vor.u32 1.1754944e-38, %v3303_v26 }
 0x2b5   : > { %v3340_v17 = vmul.f32 %v3942_v18, %v3339_v42  ;;  %v3169_v25 = vadd.f32 1.0, %v3944_v45  ;;  %vm3302_vm11 = vcmp.eq.f32.partialorder %v3301_v37, 8.507059e+37 }
 0x2b6   : > { %3381 = vst.msk [vmem:[%s5206_s22 + $0x28] sm:$0xff] %vm309_vm1, %v3369_v55 }
 0x2b7   : > { %v3341_v0 = vadd.f32 %v3942_v18, %v3340_v17  ;;  %3947 = vrcp.f32 %v3169_v25  ;;  %v3318_v47 = vand.u32 2147483648, %v3169_v25  ;;  %v3316_v3 = vand.u32 2147483647, %v3169_v25 }
 0x2b8   : > { %v3946_v57 = vpop.eup %3945  ;;  %vm3312_vm15 = vweird.f32 %v3169_v25 }
 0x2b9   : > { %v3345_v24 = vsel %vm3344_vm8, %v3942_v18, %v3341_v0  ;;  %v3293_v12 = vmul.f32 %v3946_v57, %v3168_v23  ;;  %vm3298_vm9 = vweird.f32 %v3946_v57  ;;  %v3319_v35 = vor.u32 1.1754944e-38, %v3318_v47 }
 0x2ba   : > { %v3350_v6 = vsel %vm3347_vm10, %v3349_v14, %v3345_v24  ;;  %vm3299_vm5 = vmor %vm3297_vm13, %vm3298_vm9  ;;  %vm3317_vm6 = vcmp.eq.f32.partialorder %v3316_v3, 8.507059e+37 }
 0x2bb   : > { %v3363_v58 = vadd.f32 %v3350_v6, %v5156_v8  ;;  %v3294_v52 = vsub.f32 1.0, %v3293_v12 }
 0x2bd   : > { %v3948_v59 = vpop.eup %3947  ;;  %v3375_v44 = vmul.f32 0.25, %v3363_v58  ;;  %v3295_v49 = vmul.f32 %v3946_v57, %v3294_v52 }
 0x2be   : > { %v3308_v63 = vmul.f32 %v3948_v59, %v3169_v25  ;;  %vm3313_vm14 = vweird.f32 %v3948_v59 }
 0x2bf   : > { %3387 = vst.msk [vmem:[%s5206_s22 + $0x58] sm:$0xff] %vm309_vm1, %v3375_v44  ;;  %v3296_v30 = vadd.f32 %v3946_v57, %v3295_v49  ;;  %vm3314_vm4 = vmor %vm3312_vm15, %vm3313_vm14 }
 0x2c0   : > { %v3309_v15 = vsub.f32 1.0, %v3308_v63 }
 0x2c1   : > { %v3300_v22 = vsel %vm3299_vm5, %v3946_v57, %v3296_v30 }
 0x2c2   : > { %v3305_v8 = vsel %vm3302_vm11, %v3304_v21, %v3300_v22  ;;  %v3310_v40 = vmul.f32 %v3948_v59, %v3309_v15 }
 0x2c3   : > { %v3360_v41 = vadd.f32 %v3305_v8, %v5171_v29 }
 0x2c4   : > { %v3311_v19 = vadd.f32 %v3948_v59, %v3310_v40 }
 0x2c5   : > { %v3372_v32 = vmul.f32 0.25, %v3360_v41 }
 0x2c6   : > { %v3315_v51 = vsel %vm3314_vm4, %v3948_v59, %v3311_v19 }
 0x2c7   : > { %3384 = vst.msk [vmem:[%s5206_s22 + $0x40] sm:$0xff] %vm309_vm1, %v3372_v32  ;;  %v3320_v60 = vsel %vm3317_vm6, %v3319_v35, %v3315_v51 }
 0x2c8   : > { %v3361_v9 = vadd.f32 %v3320_v60, %v5232_v2 }
 0x2ca   : > { %v3373_v28 = vmul.f32 0.25, %v3361_v9 }
 0x2cc   : > { %3385 = vst.msk [vmem:[%s5206_s22 + $0x48] sm:$0xff] %vm309_vm1, %v3373_v28 }
 0x2cd PF: > { %s12_s11 = sadd.s32 1, %s3971_s11   ;;  %s5557_s9 = smov %s3967_s10 }
 0x2ce   : > { %p9_p5 = scmp.ge.s32.totalorder %s12_s11, 4   ;;  %s5558_s10 = smov %s5560_s12 }
 0x2d0   :  { %11 = sbr.rel (!%p9_p5) target bundleno = 2 (0x2), region = 80 }

</bundles_post_ra>
